<compile_context>
chip_gen: v6e
topology: v6e:2x2x1
jax: 0.10.0
libtpu: 0.0.40
codegen_flags: <defaults>
</compile_context>

<pallas_src>
import functools

import jax
import jax.numpy as jnp
from jax.experimental import pallas as pl
from jax.experimental.pallas import tpu as pltpu


def _round_up(x, m):
    return ((x + m - 1) // m) * m


def _review_encoder_kernel(x_ref, wc_ref, bc_ref, idv_ref, w1_ref, b1_ref,
                           a1_ref, out_ref, *, conv_len, seq_tile, seq_valid):
    # x_ref   : (TB, Lt + conv_len - 1, D) bf16, zero-padded review embeddings
    # wc_ref  : (conv_len, D, K) bf16, conv weight (tap, in, out)
    # bc_ref  : (1, K)  f32, conv bias
    # idv_ref : (TB, E) f32, id embeddings for this batch tile
    # w1_ref  : (E, A)  f32, linear weight (transposed from torch)
    # b1_ref  : (1, A)  f32, linear bias
    # a1_ref  : (A, K)  f32, attention matrix A1
    # out_ref : (TB, K) f32, pooled output for this batch tile
    tb = out_ref.shape[0]
    kn = out_ref.shape[1]
    dd = x_ref.shape[2]

    # --- Conv1d (+ bias, ReLU): conv_len shifted-slice tap matmuls, f32 acc ---
    # In-kernel im2col: each tap is a static sublane-shifted view of the single
    # streamed embedding block (no host-side conv_len x slab).
    c2 = jnp.zeros((tb * seq_tile, kn), jnp.float32)
    for dk in range(conv_len):          # unrolled at trace time; conv_len small
        xs = x_ref[:, dk:dk + seq_tile, :].reshape(tb * seq_tile, dd)   # bf16
        c2 = c2 + jnp.dot(xs, wc_ref[dk], preferred_element_type=jnp.float32)
    c2 = jnp.maximum(c2 + bc_ref[...], 0.0)
    c = c2.reshape(tb, seq_tile, kn)                     # (TB, Lt, K) f32
    # TODO(synk): nn.Dropout(p=1.0) is identity in eval mode; training-mode
    # dropout (which would zero everything at p=1.0) is not reproduced here.

    # --- attention query: qw = relu(id_vec @ W1 + b1); g = qw @ A1 (f32) ---
    qw = jnp.maximum(
        jnp.dot(idv_ref[...], w1_ref[...], preferred_element_type=jnp.float32)
        + b1_ref[...], 0.0)                              # (TB, A)
    g = jnp.dot(qw, a1_ref[...], preferred_element_type=jnp.float32)  # (TB, K)

    # --- scores over sequence, masked softmax, weighted pooling (all f32) ---
    scores = jnp.sum(c * g[:, None, :], axis=2)          # (TB, Lt)
    if seq_valid != seq_tile:   # mask rows added to sublane-align the sequence
        pos = jax.lax.broadcasted_iota(jnp.int32, (tb, seq_tile), 1)
        scores = jnp.where(pos < seq_valid, scores, -1e30)
    m = jnp.max(scores, axis=1, keepdims=True)           # (TB, 1)
    e = jnp.exp(scores - m)
    # Exact reciprocal: approx=True was the source of the previous 3.4e-4 error.
    alph = e / jnp.sum(e, axis=1, keepdims=True)
    d = jnp.sum(c * alph[:, :, None], axis=1)            # (TB, K)
    out_ref[...] = d.astype(out_ref.dtype)


def review_encoder_forward(review, ids, params, *, conv_len,
                           vmem_budget_bytes=20 * 1024 * 1024):
    """Pallas forward pass. review: (B, L) int32, ids: (B,) int32.

    Returns d of shape (B, conv_kernel_num, 1), matching PyTorch.
    """
    word_weights = params["word_weights"]   # (V, D) f32
    id_weights = params["id_weights"]       # (Nid, E) f32
    wc = params["conv_w"]                   # (k, D, K) f32
    bc = params["conv_b"]                   # (1, K) f32
    w1 = params["l1_w"]                     # (E, A) f32
    b1 = params["l1_b"]                     # (1, A) f32
    a1 = params["A1"]                       # (A, K) f32

    B, L = review.shape
    D = word_weights.shape[1]
    K = wc.shape[2]
    E = id_weights.shape[1]
    A = w1.shape[1]
    pad = (conv_len - 1) // 2
    L_out = L + 2 * pad - conv_len + 1      # == L for odd conv_len ('same')
    L_t = _round_up(L_out, 8)               # sublane-aligned conv output length
    L_x = L_t + conv_len - 1                # padded input length kernel slices

    # --- batch tile from a VMEM byte budget (everything that scales with TB) --
    per_row = (2 * (L_x * D * 2)              # bf16 x block, double-buffered
               + 2 * (E * 4) + 2 * (K * 4)    # idv / out blocks, double-buffered
               + 3 * (L_t * K * 4)            # f32 conv activation + temporaries
               + 8 * (L_t * 4))               # scores / softmax rows
    TB = max(8, min(int(vmem_budget_bytes) // per_row, 2048) // 8 * 8)
    B_pad8 = _round_up(B, 8)
    TB = min(TB, B_pad8)
    if TB >= B_pad8 and B_pad8 >= 16:
        # Keep >= 2 grid blocks so the "parallel" axis can shard across the two
        # TensorCores on v7x (each TC has its own HBM ports).
        TB = _round_up(B_pad8 // 2, 8)
    B_pad = _round_up(B, TB)
    n_blocks = B_pad // TB

    # --- glue (plain JAX): embedding gathers + zero padding; bf16 streaming ---
    # TODO(synk): fuse the word-embedding gather into the kernel (scalar-
    # prefetched indices + DMA gather) to also remove the XLA write+read of rv.
    rv = jnp.take(word_weights.astype(jnp.bfloat16), review, axis=0)  # (B,L,D)
    x = jnp.pad(rv, ((0, B_pad - B), (pad, L_x - pad - L), (0, 0)))   # (B_pad,L_x,D)

    idv = jnp.take(id_weights, ids, axis=0)                 # (B, E) f32
    idv = jnp.pad(idv, ((0, B_pad - B), (0, 0)))            # (B_pad, E)

    wc_bf = wc.astype(jnp.bfloat16)                         # (k, D, K) bf16

    # TODO(synk): padding K up to 128 lanes would make the (TB, K) output store
    # lane-dense; skipped since the kernel is HBM-bound and K-traffic is tiny.

    kernel = functools.partial(_review_encoder_kernel, conv_len=conv_len,
                               seq_tile=L_t, seq_valid=L_out)

    out = pl.pallas_call(
        kernel,
        out_shape=jax.ShapeDtypeStruct((B_pad, K), jnp.float32),
        grid_spec=pltpu.PrefetchScalarGridSpec(
            num_scalar_prefetch=0,
            grid=(n_blocks,),
            in_specs=[
                pl.BlockSpec((TB, L_x, D), lambda b: (b, 0, 0)),
                # Weights: constant block index => stay VMEM-resident.
                pl.BlockSpec((conv_len, D, K), lambda b: (0, 0, 0)),
                pl.BlockSpec((1, K), lambda b: (0, 0)),
                pl.BlockSpec((TB, E), lambda b: (b, 0)),
                pl.BlockSpec((E, A), lambda b: (0, 0)),
                pl.BlockSpec((1, A), lambda b: (0, 0)),
                pl.BlockSpec((A, K), lambda b: (0, 0)),
            ],
            out_specs=pl.BlockSpec((TB, K), lambda b: (b, 0)),
        ),
        compiler_params=pltpu.CompilerParams(
            dimension_semantics=("parallel",),
            vmem_limit_bytes=48 * 1024 * 1024),
    )(x, wc_bf, bc, idv, w1, b1, a1)

    return out[:B, :, None]                                  # (B, K, 1)


def review_encoder_reference(review, ids, params, *, conv_len,
                             stream_dtype=jnp.float32):
    """Pure-JAX reference mirroring the PyTorch forward (eval mode).

    stream_dtype=bfloat16 reproduces the kernel's operand rounding: the kernel
    streams word embeddings and conv weights in bf16 and accumulates in f32.
    """
    ww = params["word_weights"].astype(stream_dtype).astype(jnp.float32)
    wc = params["conv_w"].astype(stream_dtype).astype(jnp.float32)
    id_weights = params["id_weights"]
    bc = params["conv_b"]
    w1 = params["l1_w"]
    b1 = params["l1_b"]
    a1 = params["A1"]

    B, L = review.shape
    pad = (conv_len - 1) // 2
    L_out = L + 2 * pad - conv_len + 1

    rv = jnp.take(ww, review, axis=0)                         # (B, L, D)
    x_pad = jnp.pad(rv, ((0, 0), (pad, pad), (0, 0)))
    cols = jnp.stack([x_pad[:, dk:dk + L_out, :] for dk in range(conv_len)],
                     axis=2)                                  # (B, L, k, D)
    c = jnp.einsum("blkd,kdo->blo", cols, wc,
                   preferred_element_type=jnp.float32) + bc   # (B, L, K)
    c = jnp.maximum(c, 0.0)

    idv = jnp.take(id_weights, ids, axis=0)                   # (B, E)
    qw = jnp.maximum(idv @ w1 + b1, 0.0)                      # (B, A)
    g = qw @ a1                                               # (B, K)
    scores = jnp.einsum("blo,bo->bl", c, g)                   # (B, L)
    alph = jax.nn.softmax(scores, axis=1)
    d = jnp.einsum("blo,bl->bo", c, alph)                     # (B, K)
    return d[:, :, None]                                      # (B, K, 1)


if __name__ == "__main__":
    # Small shapes consistent with the module.
    B = 2               # batch
    L = 16              # review length (sequence)
    VOCAB = 50          # word vocabulary size
    D = 32              # word_vec_dim
    CONV_LEN = 3        # conv_length (odd -> 'same' output length)
    K = 16              # conv_kernel_num
    NID = 10            # id_matrix_len
    E = 8               # id_embedding_dim
    A = 12              # atten_vec_dim

    key = jax.random.PRNGKey(0)
    keys = jax.random.split(key, 10)

    params = {
        "word_weights": jax.random.normal(keys[0], (VOCAB, D), jnp.float32) * 0.1,
        "id_weights":   jax.random.normal(keys[1], (NID, E), jnp.float32) * 0.1,
        # PyTorch Conv1d weight is (K, D, k); store as (k, D, K).
        "conv_w": jnp.transpose(
            jax.random.normal(keys[2], (K, D, CONV_LEN), jnp.float32) * 0.1,
            (2, 1, 0)),
        "conv_b": jax.random.normal(keys[3], (1, K), jnp.float32) * 0.1,
        # PyTorch Linear weight is (A, E); store transposed as (E, A).
        "l1_w": jnp.transpose(
            jax.random.normal(keys[4], (A, E), jnp.float32) * 0.1),
        "l1_b": jax.random.normal(keys[5], (1, A), jnp.float32) * 0.1,
        "A1":   jax.random.normal(keys[6], (A, K), jnp.float32) * 0.1,
    }

    review = jax.random.randint(keys[7], (B, L), 0, VOCAB, dtype=jnp.int32)
    ids = jax.random.randint(keys[8], (B,), 0, NID, dtype=jnp.int32)

    d = review_encoder_forward(review, ids, params, conv_len=CONV_LEN)
    d = jax.block_until_ready(d)
    assert d.shape == (B, K, 1), d.shape

    # Tight check: reference with the same bf16 rounding of the streamed
    # operands (word embeddings + conv weight); remaining delta is only f32
    # accumulation order, so this is a real correctness gate.
    d_bf = review_encoder_reference(review, ids, params, conv_len=CONV_LEN,
                                    stream_dtype=jnp.bfloat16)
    assert jnp.allclose(d, d_bf, atol=2e-4, rtol=2e-3), (
        float(jnp.max(jnp.abs(d - d_bf))))

    # Loose check: pure-f32 reference (PyTorch eval-mode semantics); the
    # difference is the documented bf16 streaming of the conv operands.
    d_f32 = review_encoder_reference(review, ids, params, conv_len=CONV_LEN)
    assert jnp.allclose(d, d_f32, atol=2e-2, rtol=2e-2), (
        float(jnp.max(jnp.abs(d - d_f32))))

    print("KERNEL_OK")
</pallas_src>

<mosaic_0001>
module attributes {stable_mosaic.version = 11 : i64} {
  func.func @_review_encoder_kernel(%arg0: i32, %arg1: memref<8x18x32xbf16, #tpu.memory_space<vmem>>, %arg2: memref<3x32x16xbf16, #tpu.memory_space<vmem>>, %arg3: memref<1x16xf32, #tpu.memory_space<vmem>>, %arg4: memref<8x8xf32, #tpu.memory_space<vmem>>, %arg5: memref<8x12xf32, #tpu.memory_space<vmem>>, %arg6: memref<1x12xf32, #tpu.memory_space<vmem>>, %arg7: memref<12x16xf32, #tpu.memory_space<vmem>>, %arg8: memref<8x16xf32, #tpu.memory_space<vmem>>) attributes {dimension_semantics = [#tpu.dimension_semantics<parallel>], iteration_bounds = array<i64: 1>, scalar_prefetch = 0 : i64, scratch_operands = 0 : i64, tpu.core_type = #tpu.core_type<tc>, window_params = [{transform_indices = @transform_0, window_bounds = array<i64: 8, 18, 32>}, {pipeline_mode = #tpu.pipeline_mode<synchronous>, transform_indices = @transform_1, window_bounds = array<i64: 3, 32, 16>}, {pipeline_mode = #tpu.pipeline_mode<synchronous>, transform_indices = @transform_2, window_bounds = array<i64: 1, 16>}, {transform_indices = @transform_3, window_bounds = array<i64: 8, 8>}, {pipeline_mode = #tpu.pipeline_mode<synchronous>, transform_indices = @transform_4, window_bounds = array<i64: 8, 12>}, {pipeline_mode = #tpu.pipeline_mode<synchronous>, transform_indices = @transform_5, window_bounds = array<i64: 1, 12>}, {pipeline_mode = #tpu.pipeline_mode<synchronous>, transform_indices = @transform_6, window_bounds = array<i64: 12, 16>}, {transform_indices = @transform_7, window_bounds = array<i64: 8, 16>}]} {
    %cst = arith.constant 0.000000e+00 : f32
    %0 = vector.broadcast %cst : f32 to vector<128x16xf32>
    %c0 = arith.constant 0 : index
    %c0_0 = arith.constant 0 : index
    %c0_1 = arith.constant 0 : index
    %1 = vector.load %arg1[%c0, %c0_0, %c0_1] : memref<8x18x32xbf16, #tpu.memory_space<vmem>>, vector<8x16x32xbf16>
    %2 = vector.shape_cast %1 : vector<8x16x32xbf16> to vector<128x32xbf16>
    %c0_2 = arith.constant 0 : index
    %c0_3 = arith.constant 0 : index
    %c0_4 = arith.constant 0 : index
    %3 = vector.load %arg2[%c0_2, %c0_3, %c0_4] : memref<3x32x16xbf16, #tpu.memory_space<vmem>>, vector<1x32x16xbf16>
    %4 = vector.shape_cast %3 : vector<1x32x16xbf16> to vector<32x16xbf16>
    %cst_5 = arith.constant dense<0.000000e+00> : vector<128x16xf32>
    %5 = tpu.matmul %2, %4, %cst_5 {dimension_numbers = #tpu.dot_dimension_numbers<[1], [0], [0], [1], [0, 0, 1, 1], [], []>} : vector<128x32xbf16>, vector<32x16xbf16>, vector<128x16xf32> -> vector<128x16xf32>
    %6 = arith.addf %0, %5 : vector<128x16xf32>
    %c0_6 = arith.constant 0 : index
    %c1 = arith.constant 1 : index
    %c0_7 = arith.constant 0 : index
    %7 = vector.load %arg1[%c0_6, %c1, %c0_7] : memref<8x18x32xbf16, #tpu.memory_space<vmem>>, vector<8x16x32xbf16>
    %8 = vector.shape_cast %7 : vector<8x16x32xbf16> to vector<128x32xbf16>
    %c1_8 = arith.constant 1 : index
    %c0_9 = arith.constant 0 : index
    %c0_10 = arith.constant 0 : index
    %9 = vector.load %arg2[%c1_8, %c0_9, %c0_10] : memref<3x32x16xbf16, #tpu.memory_space<vmem>>, vector<1x32x16xbf16>
    %10 = vector.shape_cast %9 : vector<1x32x16xbf16> to vector<32x16xbf16>
    %cst_11 = arith.constant dense<0.000000e+00> : vector<128x16xf32>
    %11 = tpu.matmul %8, %10, %cst_11 {dimension_numbers = #tpu.dot_dimension_numbers<[1], [0], [0], [1], [0, 0, 1, 1], [], []>} : vector<128x32xbf16>, vector<32x16xbf16>, vector<128x16xf32> -> vector<128x16xf32>
    %12 = arith.addf %6, %11 : vector<128x16xf32>
    %c0_12 = arith.constant 0 : index
    %c2 = arith.constant 2 : index
    %c0_13 = arith.constant 0 : index
    %13 = vector.load %arg1[%c0_12, %c2, %c0_13] : memref<8x18x32xbf16, #tpu.memory_space<vmem>>, vector<8x16x32xbf16>
    %14 = vector.shape_cast %13 : vector<8x16x32xbf16> to vector<128x32xbf16>
    %c2_14 = arith.constant 2 : index
    %c0_15 = arith.constant 0 : index
    %c0_16 = arith.constant 0 : index
    %15 = vector.load %arg2[%c2_14, %c0_15, %c0_16] : memref<3x32x16xbf16, #tpu.memory_space<vmem>>, vector<1x32x16xbf16>
    %16 = vector.shape_cast %15 : vector<1x32x16xbf16> to vector<32x16xbf16>
    %cst_17 = arith.constant dense<0.000000e+00> : vector<128x16xf32>
    %17 = tpu.matmul %14, %16, %cst_17 {dimension_numbers = #tpu.dot_dimension_numbers<[1], [0], [0], [1], [0, 0, 1, 1], [], []>} : vector<128x32xbf16>, vector<32x16xbf16>, vector<128x16xf32> -> vector<128x16xf32>
    %18 = arith.addf %12, %17 : vector<128x16xf32>
    %c0_18 = arith.constant 0 : index
    %c0_19 = arith.constant 0 : index
    %19 = vector.load %arg3[%c0_18, %c0_19] : memref<1x16xf32, #tpu.memory_space<vmem>>, vector<1x16xf32>
    %20 = vector.broadcast %19 : vector<1x16xf32> to vector<128x16xf32>
    %21 = arith.addf %18, %20 : vector<128x16xf32>
    %cst_20 = arith.constant 0.000000e+00 : f32
    %22 = vector.broadcast %cst_20 : f32 to vector<128x16xf32>
    %23 = arith.maximumf %21, %22 : vector<128x16xf32>
    %24 = vector.shape_cast %23 : vector<128x16xf32> to vector<8x16x16xf32>
    %c0_21 = arith.constant 0 : index
    %c0_22 = arith.constant 0 : index
    %25 = vector.load %arg4[%c0_21, %c0_22] : memref<8x8xf32, #tpu.memory_space<vmem>>, vector<8x8xf32>
    %c0_23 = arith.constant 0 : index
    %c0_24 = arith.constant 0 : index
    %26 = vector.load %arg5[%c0_23, %c0_24] : memref<8x12xf32, #tpu.memory_space<vmem>>, vector<8x12xf32>
    %cst_25 = arith.constant dense<0.000000e+00> : vector<8x12xf32>
    %27 = tpu.matmul %25, %26, %cst_25 {dimension_numbers = #tpu.dot_dimension_numbers<[1], [0], [0], [1], [0, 0, 1, 1], [], []>} : vector<8x8xf32>, vector<8x12xf32>, vector<8x12xf32> -> vector<8x12xf32>
    %c0_26 = arith.constant 0 : index
    %c0_27 = arith.constant 0 : index
    %28 = vector.load %arg6[%c0_26, %c0_27] : memref<1x12xf32, #tpu.memory_space<vmem>>, vector<1x12xf32>
    %29 = vector.broadcast %28 : vector<1x12xf32> to vector<8x12xf32>
    %30 = arith.addf %27, %29 : vector<8x12xf32>
    %cst_28 = arith.constant 0.000000e+00 : f32
    %31 = vector.broadcast %cst_28 : f32 to vector<8x12xf32>
    %32 = arith.maximumf %30, %31 : vector<8x12xf32>
    %c0_29 = arith.constant 0 : index
    %c0_30 = arith.constant 0 : index
    %33 = vector.load %arg7[%c0_29, %c0_30] : memref<12x16xf32, #tpu.memory_space<vmem>>, vector<12x16xf32>
    %cst_31 = arith.constant dense<0.000000e+00> : vector<8x16xf32>
    %34 = tpu.matmul %32, %33, %cst_31 {dimension_numbers = #tpu.dot_dimension_numbers<[1], [0], [0], [1], [0, 0, 1, 1], [], []>} : vector<8x12xf32>, vector<12x16xf32>, vector<8x16xf32> -> vector<8x16xf32>
    %35 = vector.shape_cast %34 : vector<8x16xf32> to vector<8x1x16xf32>
    %36 = vector.broadcast %35 : vector<8x1x16xf32> to vector<8x16x16xf32>
    %37 = arith.mulf %24, %36 : vector<8x16x16xf32>
    %cst_32 = arith.constant dense<0.000000e+00> : vector<8x16xf32>
    %38 = vector.multi_reduction <add>, %37, %cst_32 [2] : vector<8x16x16xf32> to vector<8x16xf32>
    %cst_33 = arith.constant dense<0xFF800000> : vector<8xf32>
    %39 = vector.multi_reduction <maximumf>, %38, %cst_33 [1] : vector<8x16xf32> to vector<8xf32>
    %40 = vector.shape_cast %39 : vector<8xf32> to vector<8x1xf32>
    %41 = vector.broadcast %40 : vector<8x1xf32> to vector<8x16xf32>
    %42 = arith.subf %38, %41 : vector<8x16xf32>
    %43 = math.exp %42 : vector<8x16xf32>
    %cst_34 = arith.constant dense<0.000000e+00> : vector<8xf32>
    %44 = vector.multi_reduction <add>, %43, %cst_34 [1] : vector<8x16xf32> to vector<8xf32>
    %45 = vector.shape_cast %44 : vector<8xf32> to vector<8x1xf32>
    %46 = vector.broadcast %45 : vector<8x1xf32> to vector<8x16xf32>
    %47 = arith.divf %43, %46 : vector<8x16xf32>
    %48 = vector.shape_cast %47 : vector<8x16xf32> to vector<8x16x1xf32>
    %49 = vector.broadcast %48 : vector<8x16x1xf32> to vector<8x16x16xf32>
    %50 = arith.mulf %24, %49 : vector<8x16x16xf32>
    %cst_35 = arith.constant dense<0.000000e+00> : vector<8x16xf32>
    %51 = vector.multi_reduction <add>, %50, %cst_35 [1] : vector<8x16x16xf32> to vector<8x16xf32>
    %c0_36 = arith.constant 0 : index
    %c0_37 = arith.constant 0 : index
    %52 = vector.load %arg8[%c0_36, %c0_37] : memref<8x16xf32, #tpu.memory_space<vmem>>, vector<8x16xf32>
    tpu.vector_store %arg8[%c0_36, %c0_37], %51 {strides = array<i32>} : memref<8x16xf32, #tpu.memory_space<vmem>>, vector<8x16xf32>,
    return
  }
  func.func @transform_0(%arg0: i32) -> (i32, i32, i32) {
    %c0_i32 = arith.constant 0 : i32
    %c0_i32_0 = arith.constant 0 : i32
    %c0_i32_1 = arith.constant 0 : i32
    return %arg0, %c0_i32, %c0_i32_0 : i32, i32, i32
  }
  func.func @transform_1(%arg0: i32) -> (i32, i32, i32) {
    %c0_i32 = arith.constant 0 : i32
    %c0_i32_0 = arith.constant 0 : i32
    %c0_i32_1 = arith.constant 0 : i32
    %c0_i32_2 = arith.constant 0 : i32
    return %c0_i32, %c0_i32_0, %c0_i32_1 : i32, i32, i32
  }
  func.func @transform_2(%arg0: i32) -> (i32, i32) {
    %c0_i32 = arith.constant 0 : i32
    %c0_i32_0 = arith.constant 0 : i32
    %c0_i32_1 = arith.constant 0 : i32
    return %c0_i32, %c0_i32_0 : i32, i32
  }
  func.func @transform_3(%arg0: i32) -> (i32, i32) {
    %c0_i32 = arith.constant 0 : i32
    %c0_i32_0 = arith.constant 0 : i32
    return %arg0, %c0_i32 : i32, i32
  }
  func.func @transform_4(%arg0: i32) -> (i32, i32) {
    %c0_i32 = arith.constant 0 : i32
    %c0_i32_0 = arith.constant 0 : i32
    %c0_i32_1 = arith.constant 0 : i32
    return %c0_i32, %c0_i32_0 : i32, i32
  }
  func.func @transform_5(%arg0: i32) -> (i32, i32) {
    %c0_i32 = arith.constant 0 : i32
    %c0_i32_0 = arith.constant 0 : i32
    %c0_i32_1 = arith.constant 0 : i32
    return %c0_i32, %c0_i32_0 : i32, i32
  }
  func.func @transform_6(%arg0: i32) -> (i32, i32) {
    %c0_i32 = arith.constant 0 : i32
    %c0_i32_0 = arith.constant 0 : i32
    %c0_i32_1 = arith.constant 0 : i32
    return %c0_i32, %c0_i32_0 : i32, i32
  }
  func.func @transform_7(%arg0: i32) -> (i32, i32) {
    %c0_i32 = arith.constant 0 : i32
    %c0_i32_0 = arith.constant 0 : i32
    return %arg0, %c0_i32 : i32, i32
  }
}

</mosaic_0001>

<bundles_post_ra>
// kernel: tpu_custom_call.1
= control target key start
LH: loop header
LB: loop body
LE: loop exit
PB: predicated region body
PF: predicated region fallthrough
CT: control target
= control target key end

     0   :  { %vm56_vm0 = vsmask.f32 3328  ;;  %vm57_vm1 = vsmask.f32 7440  ;;  %vm292_vm2 = vcmask 261120   ;;  %s3001_s0 = inlined_call_operand.vmem [shape: bf16[8,18,32], index: 0, kind: input, shape index: {}]   ;;  %s3002_s1 = inlined_call_operand.vmem [shape: bf16[3,32,16], index: 1, kind: input, shape index: {}]   ;;  %s3003_s2 = inlined_call_operand.vmem [shape: f32[1,16], index: 2, kind: input, shape index: {}]   ;;  %s3004_s3 = inlined_call_operand.vmem [shape: f32[8,8], index: 3, kind: input, shape index: {}]   ;;  %s3005_s4 = inlined_call_operand.vmem [shape: f32[8,12], index: 4, kind: input, shape index: {}]   ;;  %s3006_s5 = inlined_call_operand.vmem [shape: f32[1,12], index: 5, kind: input, shape index: {}]   ;;  %s3007_s6 = inlined_call_operand.vmem [shape: f32[12,16], index: 6, kind: input, shape index: {}]   ;;  %s3008_s7 = inlined_call_operand.hbm [shape: f32[8,16], index: 7, kind: output, shape index: {}]  }
   0x1   :  { %v2009_v0 = vld [vmem:[%s3002_s1 + $0x18] sm:$0xff]   ;;  %v2010_v1 = vld [vmem:[%s3002_s1 + $0x10] sm:$0xff]   ;;  %v2147_v2 = vld [vmem:[%s3001_s0] sm:$0xf] }
   0x2   :  { %1998 = vmatprep.subr.bf16.mxu1 %v2009_v0  ;;  %1926 = vmatprep.subr.bf16.mxu0 %v2009_v0  ;;  %v2152_v3 = vld [vmem:[%s3001_s0 + $0x4] sm:$0xf]  ;;  %v2157_v4 = vld [vmem:[%s3001_s0 + $0x8] sm:$0x1]  ;;  %v60_v5 = vshrl.u32 %v2147_v2, 16  ;;  %v63_v6 = vshll.u32 %v2147_v2, 16  ;;  %vm2190_vm3 = vmor %vm56_vm0, %vm57_vm1 }
   0x3   :  { %2000 = vmatpush3.bf16.msra.mxu1 %v2009_v0  ;;  %1927 = vmatpush3.bf16.msra.mxu0 %v2009_v0  ;;  %v69_v7 = vshll.u32 %v2152_v3, 16  ;;  %v73_v8 = vshrl.u32 %v2152_v3, 16  ;;  %v79_v9 = vshll.u32 %v2157_v4, 16  ;;  %v2167_v10 = vld [vmem:[%s3001_s0 + $0x48] sm:$0xf]  ;;  %v1838_v62 = vcombine.low %v2147_v2, %v2152_v3 }
   0x4   :  { %1999 = vmatprep.subr.bf16.mxu1 %v2010_v1  ;;  %1928 = vmatprep.subr.bf16.mxu0 %v2010_v1  ;;  %v62_v11 = vrot.slane %v60_v5, 4  ;;  %v65_v12 = vrot.slane %v63_v6, 5  ;;  %v2172_v13 = vld [vmem:[%s3001_s0 + $0x4c] sm:$0xf]  ;;  %v2177_v14 = vld [vmem:[%s3001_s0 + $0x50] sm:$0x1] }
   0x5   :  { %v71_v15 = vrot.slane %v69_v7, 5  ;;  %v75_v16 = vrot.slane %v73_v8, 4  ;;  %v204_v17 = vshrl.u32 %v2167_v10, 16  ;;  %v207_v19 = vshll.u32 %v2167_v10, 16  ;;  %v2186_v22 = vld [vmem:[%s3002_s1 + $0x8] sm:$0xff]  }
   0x6   :  { %v66_v18 = vor.u32 %v65_v12, %v62_v11  ;;  %v213_v20 = vshll.u32 %v2172_v13, 16  ;;  %v217_v21 = vshrl.u32 %v2172_v13, 16  ;;  %v81_v25 = vrot.slane %v79_v9, 5  ;;  %v2198_v28 = vld [vmem:[%s3001_s0 + $0xc] sm:$0xf] }
   0x7   :  { %2001 = vmatpush3.bf16.msra.mxu1 %v2010_v1  ;;  %1929 = vmatpush3.bf16.msra.mxu0 %v2010_v1  ;;  %v76_v24 = vor.u32 %v75_v16, %v71_v15  ;;  %v206_v26 = vrot.slane %v204_v17, 4  ;;  %v223_v27 = vshll.u32 %v2177_v14, 16  ;;  %v209_v30 = vrot.slane %v207_v19, 5  ;;  %v2204_v33 = vld [vmem:[%s3001_s0 + $0x10] sm:$0xf]  ;;  %v2017_v48 = vld [vmem:[%s3002_s1 + $0x28] sm:$0xff]  }
   0x8   :  { %v67_v29 = vrot.slane %v66_v18, 4  ;;  %v215_v31 = vrot.slane %v213_v20, 5  ;;  %v219_v32 = vrot.slane %v217_v21, 4  ;;  %1946 = vmatprep.subr.bf16.mxu1 %v2186_v22  ;;  %v84_v36 = vshrl.u32 %v2198_v28, 16  ;;  %v2213_v41 = vld [vmem:[%s3001_s0 + $0x14] sm:$0x1]  ;;  %1966 = vmatprep.subr.bf16.mxu0 %v2017_v48 }
   0x9   :  { %v77_v34 = vrot.slane %v76_v24, 4  ;;  %v225_v35 = vrot.slane %v223_v27, 5  ;;  %v87_v37 = vshll.u32 %v2198_v28, 16  ;;  %v210_v39 = vor.u32 %v209_v30, %v206_v26  ;;  %v2222_v47 = vld [vmem:[%s3001_s0 + $0x54] sm:$0xf] }
   0xa   :  { %v72_v38 = vsel %vm2190_vm3, %v67_v29, %v71_v15  ;;  %v220_v40 = vor.u32 %v219_v32, %v215_v31  ;;  %v93_v42 = vshll.u32 %v2204_v33, 16  ;;  %v86_v44 = vrot.slane %v84_v36, 4  ;;  %v2231_v56 = vld [vmem:[%s3001_s0 + $0x58] sm:$0xf]  ;;  %v2241_v59 = vld [vmem:[%s3001_s0 + $0x5c] sm:$0x1] }
   0xb   :  { %v82_v43 = vsel %vm2190_vm3, %v77_v34, %v81_v25  ;;  %v89_v45 = vrot.slane %v87_v37, 5  ;;  %v97_v46 = vshrl.u32 %v2204_v33, 16  ;;  %v211_v50 = vrot.slane %v210_v39, 4  ;;  %v2247_v61 = vld [vmem:[%s3001_s0 + $0x18] sm:$0xf]  ;;  %v2018_v37 = vld [vmem:[%s3002_s1 + $0x20] sm:$0xff]  }
   0xc   :  { %v1820_v49 = vcombine.low %v72_v38, %v82_v43  ;;  %v221_v51 = vrot.slane %v220_v40, 4  ;;  %v95_v52 = vrot.slane %v93_v42, 5  ;;  %v103_v55 = vshll.u32 %v2213_v41, 16  ;;  %v2257_v11 = vld [vmem:[%s3001_s0 + $0x1c] sm:$0xf] }
   0xd   :  { %v90_v53 = vor.u32 %v89_v45, %v86_v44  ;;  %v99_v54 = vrot.slane %v97_v46, 4  ;;  %v216_v57 = vsel %vm2190_vm3, %v211_v50, %v215_v31  ;;  %v228_v60 = vshrl.u32 %v2222_v47, 16  ;;  %v2266_v17 = vld [vmem:[%s3001_s0 + $0x20] sm:$0x1]  ;;  %v2273_v25 = vld [vmem:[%s3001_s0 + $0x24] sm:$0xf] }
   0xe   :  { %1930 = vmatprep.mubr.msk.bf16.mxu0 %vm292_vm2, %v1820_v49  ;;  %v226_v58 = vsel %vm2190_vm3, %v221_v51, %v225_v35  ;;  %v105_v5 = vrot.slane %v103_v55, 5  ;;  %v231_v7 = vshll.u32 %v2222_v47, 16  ;;  %v237_v8 = vshll.u32 %v2231_v56, 16  ;;  %v2281_v36 = vld [vmem:[%s3001_s0 + $0x28] sm:$0xf]  ;;  %v2012_v51 = vld [vmem:[%s3002_s1] sm:$0xff]  }
   0xf   :  { %v1826_v63 = vcombine.low %v216_v57, %v226_v58  ;;  %v91_v0 = vrot.slane %v90_v53, 4  ;;  %v100_v1 = vor.u32 %v99_v54, %v95_v52  ;;  %v230_v6 = vrot.slane %v228_v60, 4  ;;  %v2291_v42 = vld [vmem:[%s3001_s0 + $0x2c] sm:$0x1]  ;;  %v2299_v50 = vld [vmem:[%s3001_s0 + $0x30] sm:$0xf] }
  0x10   :  { %v241_v9 = vshrl.u32 %v2231_v56, 16  ;;  %v247_v16 = vshll.u32 %v2241_v59, 16  ;;  %v108_v18 = vshrl.u32 %v2247_v61, 16  ;;  %v233_v19 = vrot.slane %v231_v7, 5  ;;  %v2313_v7 = vld [vmem:[%s3001_s0 + $0x34] sm:$0xf] }
  0x11   :  { %1942 = vmatprep.mubr.msk.bf16.mxu1 %vm292_vm2, %v1826_v63  ;;  %v96_v12 = vsel %vm2190_vm3, %v91_v0, %v95_v52  ;;  %v101_v15 = vrot.slane %v100_v1, 4  ;;  %v239_v20 = vrot.slane %v237_v8, 5  ;;  %v111_v24 = vshll.u32 %v2247_v61, 16 }
  0x12   :  { %v243_v21 = vrot.slane %v241_v9, 4  ;;  %v249_v27 = vrot.slane %v247_v16, 5  ;;  %v110_v29 = vrot.slane %v108_v18, 4  ;;  %v117_v30 = vshll.u32 %v2257_v11, 16 }
  0x13   :  { %v106_v26 = vsel %vm2190_vm3, %v101_v15, %v105_v5  ;;  %v234_v32 = vor.u32 %v233_v19, %v230_v6  ;;  %v113_v35 = vrot.slane %v111_v24, 5  ;;  %v121_v39 = vshrl.u32 %v2257_v11, 16 }
  0x14   :  { %v1821_v31 = vcombine.low %v96_v12, %v106_v26  ;;  %v244_v34 = vor.u32 %v243_v21, %v239_v20  ;;  %v119_v38 = vrot.slane %v117_v30, 5  ;;  %v127_v40 = vshll.u32 %v2266_v17, 16  ;;  %v2345_v30 = vld [vmem:[%s3001_s0 + $0x40] sm:$0xf] }
  0x15   :  { %v132_v43 = vshrl.u32 %v2273_v25, 16  ;;  %v235_v44 = vrot.slane %v234_v32, 4  ;;  %v114_v46 = vor.u32 %v113_v35, %v110_v29  ;;  %v135_v49 = vshll.u32 %v2273_v25, 16 }
  0x16   :  { %1931 = vmatmul.mubr.msk.bf16.vlgmr.msra.gmra.mxu0 %vm292_vm2, %v1821_v31  ;;  %v245_v45 = vrot.slane %v244_v34, 4  ;;  %v123_v52 = vrot.slane %v121_v39, 4  ;;  %v129_v53 = vrot.slane %v127_v40, 5  ;;  %v141_v55 = vshll.u32 %v2281_v36, 16 }
  0x17   :  { %v134_v54 = vrot.slane %v132_v43, 4  ;;  %1967 = vmatpush3.bf16.msra.mxu0 %v2017_v48  ;;  %v240_v57 = vsel %vm2190_vm3, %v235_v44, %v239_v20  ;;  %v115_v60 = vrot.slane %v114_v46, 4  ;;  %v137_v63 = vrot.slane %v135_v49, 5 }
  0x18   :  { %v250_v58 = vsel %vm2190_vm3, %v245_v45, %v249_v27  ;;  %1968 = vmatprep.subr.bf16.mxu0 %v2018_v37  ;;  %v124_v1 = vor.u32 %v123_v52, %v119_v38  ;;  %v143_v5 = vrot.slane %v141_v55, 5  ;;  %v145_v6 = vshrl.u32 %v2281_v36, 16 }
  0x19   :  { %v1827_v0 = vcombine.low %v240_v57, %v250_v58  ;;  %v120_v48 = vsel %vm2190_vm3, %v115_v60, %v119_v38  ;;  %v138_v8 = vor.u32 %v137_v63, %v134_v54  ;;  %v151_v9 = vshll.u32 %v2291_v42, 16 }
  0x1a   :  { %v1839_v12 = vcombine.low %v2198_v28, %v2204_v33  ;;  %v125_v15 = vrot.slane %v124_v1, 4  ;;  %v147_v16 = vrot.slane %v145_v6, 4  ;;  %v156_v18 = vshrl.u32 %v2299_v50, 16  ;;  %v2331_v28 = vld [vmem:[%s3001_s0 + $0x38] sm:$0x1] }
  0x1b   :  { %1943 = vmatmul.mubr.msk.bf16.vlgmr.msra.gmra.mxu1 %vm292_vm2, %v1827_v0  ;;  %v159_v19 = vshll.u32 %v2299_v50, 16  ;;  %1969 = vmatpush3.bf16.msra.mxu0 %v2018_v37  ;;  %v139_v20 = vrot.slane %v138_v8, 4  ;;  %v153_v21 = vrot.slane %v151_v9, 5  ;;  %v165_v24 = vshll.u32 %v2313_v7, 16 }
  0x1c   :  { %1947 = vmatpush3.bf16.msra.mxu1 %v2186_v22  ;;  %1950 = vmatprep.mubr.msk.bf16.mxu1 %vm292_vm2, %v1838_v62  ;;  %v169_v26 = vshrl.u32 %v2313_v7, 16  ;;  %v130_v22 = vsel %vm2190_vm3, %v125_v15, %v129_v53  ;;  %v148_v27 = vor.u32 %v147_v16, %v143_v5  ;;  %v158_v29 = vrot.slane %v156_v18, 4  ;;  %v2340_v62 = vld [vmem:[%s3001_s0 + $0x3c] sm:$0xf] }
  0x1d   :  { %1948 = vmatprep.subr.bf16.mxu1 %v2012_v51  ;;  %v161_v2 = vrot.slane %v159_v19, 5  ;;  %v1822_v31 = vcombine.low %v120_v48, %v130_v22  ;;  %v144_v32 = vsel %vm2190_vm3, %v139_v20, %v143_v5  ;;  %v167_v34 = vrot.slane %v165_v24, 5 }
  0x1e   :  { %v171_v35 = vrot.slane %v169_v26, 4 }
  0x1f   :  { %12 = vsyncpa [#allocation3], 0  ;;  %v149_v37 = vrot.slane %v148_v27, 4  ;;  %v162_v38 = vor.u32 %v161_v2, %v158_v29  ;;  %v175_v39 = vshll.u32 %v2331_v28, 16  ;;  %v1840_v40 = vcombine.low %v2247_v61, %v2257_v11  ;;  %1934 = vmatprep.mubr.msk.bf16.mxu0 %vm292_vm2, %v1822_v31  ;;  %v2356_v44 = vld [vmem:[%s3001_s0 + $0x44] sm:$0x1] }
  0x20   :  { %1949 = vmatpush3.bf16.msra.mxu1 %v2012_v51  ;;  %v172_v43 = vor.u32 %v171_v35, %v167_v34  ;;  %v180_v45 = vshrl.u32 %v2340_v62, 16  ;;  %v183_v46 = vshll.u32 %v2340_v62, 16  ;;  %v189_v49 = vshll.u32 %v2345_v30, 16  ;;  %v888_v51 = vld [vmem:[%s3005_s4] sm:$0xff]  ;;  %v588_v24 = vld [vmem:[%s3001_s0 + $0xc] sm:$0xe] }
  0x21   :  { %v2093_v52 = vmov 0.0   ;;  %v154_v61 = vsel %vm2190_vm3, %v149_v37, %v153_v21  ;;  %v163_v53 = vrot.slane %v162_v38, 4  ;;  %v177_v54 = vrot.slane %v175_v39, 5  ;;  %v587_v48 = vld [vmem:[%s3001_s0] sm:$0xe] }
  0x22   :  { %1986 = vmatprep.subr.mxu1 %v2093_v52  ;;  %v193_v55 = vshrl.u32 %v2345_v30, 16  ;;  %v1823_v57 = vcombine.low %v144_v32, %v154_v61  ;;  %v173_v58 = vrot.slane %v172_v43, 4  ;;  %v182_v60 = vrot.slane %v180_v45, 4  ;;  %v589_v27 = vld [vmem:[%s3001_s0 + $0x18] sm:$0xe] }
  0x23   :  { %v185_v63 = vrot.slane %v183_v46, 5  ;;  %1951 = vmatmul.mubr.msk.bf16.vlgmr.msra.gmra.mxu1 %vm292_vm2, %v1839_v12  ;;  %v168_v0 = vsel %vm2190_vm3, %v163_v53, %v167_v34  ;;  %v191_v1 = vrot.slane %v189_v49, 5  ;;  %v199_v6 = vshll.u32 %v2356_v44, 16  ;;  %v590_v49 = vld [vmem:[%s3001_s0 + $0x24] sm:$0xe] }
  0x24   :  { %v195_v5 = vrot.slane %v193_v55, 4  ;;  %v619_v8 = vrot.slane %v2157_v4, 5  ;;  %1935 = vmatmul.mubr.msk.bf16.gmra.mxu0 %vm292_vm2, %v1823_v57  ;;  %1987 = vmatpush3.msra.mxu1 %v888_v51  ;;  %v178_v9 = vsel %vm2190_vm3, %v173_v58, %v177_v54  ;;  %vm611_vm4 = vcmask 1042432   ;;  %v591_v53 = vld [vmem:[%s3001_s0 + $0x30] sm:$0xe] }
  0x25   :  { %v186_v12 = vor.u32 %v185_v63, %v182_v60  ;;  %v623_v15 = vrot.slane %v2204_v33, 5  ;;  %v1824_v16 = vcombine.low %v168_v0, %v178_v9  ;;  %1954 = vmatprep.mubr.msk.bf16.mxu1 %vm292_vm2, %v1840_v40  ;;  %v201_v19 = vrot.slane %v199_v6, 5  ;;  %1991 = vmatprep.subr.mxu1 %v2093_v52 }
  0x26   :  { %v196_v18 = vor.u32 %v195_v5, %v191_v1  ;;  %vm612_vm5 = vcmask 1046532   ;;  %v1856_v4 = vrot.slane %v587_v48, 9  ;;  %v616_v21 = vrot.slane %v2152_v3, 5  ;;  %v592_v5 = vld [vmem:[%s3001_s0 + $0x3c] sm:$0xe] }
  0x27   :  { %v187_v20 = vrot.slane %v186_v12, 4  ;;  %1938 = vmatprep.mubr.msk.bf16.mxu0 %vm292_vm2, %v1824_v16  ;;  %v1841_v33 = vcombine.low %v2273_v25, %v2281_v36  ;;  %vm2390_vm6 = vmor %vm611_vm4, %vm612_vm5  ;;  %v1842_v29 = vcombine.low %v2299_v50, %v2313_v7  ;;  %v626_v25 = vrot.slane %v2213_v41, 5 }
  0x28   :  { %v197_v26 = vrot.slane %v196_v18, 4  ;;  %v617_v2 = vsel %vm2390_vm6, %v1856_v4, %v616_v21  ;;  %v618_v31 = vrot.slane %v616_v21, 4  ;;  %v1857_v34 = vrot.slane %v588_v24, 9  ;;  %v594_v21 = vld [vmem:[%s3001_s0 + $0x54] sm:$0xe] }
  0x29   :  { %v192_v3 = vsel %vm2190_vm3, %v187_v20, %v191_v1  ;;  %v625_v35 = vrot.slane %v623_v15, 4  ;;  %v1858_v39 = vrot.slane %v589_v27, 9  ;;  %v630_v40 = vrot.slane %v2257_v11, 5 }
  0x2a   :  { %v202_v32 = vsel %vm2190_vm3, %v197_v26, %v201_v19  ;;  %v620_v38 = vsel %vm2390_vm6, %v618_v31, %v619_v8  ;;  %v633_v43 = vrot.slane %v2266_v17, 5  ;;  %v624_v41 = vsel %vm2390_vm6, %v1857_v34, %v623_v15  ;;  %v593_v8 = vld [vmem:[%s3001_s0 + $0x48] sm:$0xe]  ;;  %v887_v26 = vld [vmem:[%s3004_s3] sm:$0xff] }
  0x2b   :  { %v1825_v37 = vcombine.low %v192_v3, %v202_v32  ;;  %1955 = vmatmul.mubr.msk.bf16.gmra.mxu1 %vm292_vm2, %v1841_v33  ;;  %v1868_v50 = vcombine.low %v617_v2, %v620_v38  ;;  %v632_v23 = vrot.slane %v630_v40, 4  ;;  %v627_v45 = vsel %vm2390_vm6, %v625_v35, %v626_v25  ;;  %v971_v25 = vld [vmem:[%s3007_s6] sm:$0xff] }
  0x2c   :  { %1958 = vmatprep.mubr.msk.bf16.mxu1 %vm292_vm2, %v1842_v29  ;;  %v637_v11 = vrot.slane %v2281_v36, 5  ;;  %v631_v46 = vsel %vm2390_vm6, %v1858_v39, %v630_v40  ;;  %v644_v61 = vrot.slane %v2313_v7, 5  ;;  %v1843_v51 = vcombine.low %v2340_v62, %v2345_v30 }
  0x2d   :  { %1939 = vmatmul.mubr.msk.bf16.gmra.mxu0 %vm292_vm2, %v1825_v37  ;;  %v634_v17 = vsel %vm2390_vm6, %v632_v23, %v633_v43  ;;  %v1869_v36 = vcombine.low %v624_v41, %v627_v45  ;;  %v1844_v54 = vcombine.low %v2167_v10, %v2172_v13  ;;  %v1859_v57 = vrot.slane %v590_v49, 9 }
  0x2e   :  { %1970 = vmatprep.mubr.msk.bf16.mxu0 %vm292_vm2, %v1868_v50  ;;  %v1870_v55 = vcombine.low %v631_v46, %v634_v17  ;;  %v639_v58 = vrot.slane %v637_v11, 4  ;;  %v640_v60 = vrot.slane %v2291_v42, 5  ;;  %v1860_v63 = vrot.slane %v591_v53, 9 }
  0x2f   :  { %v646_v0 = vrot.slane %v644_v61, 4  ;;  %v647_v7 = vrot.slane %v2331_v28, 5  ;;  %v638_v10 = vsel %vm2390_vm6, %v1859_v57, %v637_v11  ;;  %v651_v42 = vrot.slane %v2345_v30, 5 }
  0x30   :  { %v641_v62 = vsel %vm2390_vm6, %v639_v58, %v640_v60  ;;  %v645_v1 = vsel %vm2390_vm6, %v1860_v63, %v644_v61  ;;  %v658_v6 = vrot.slane %v2172_v13, 5  ;;  %v1845_v48 = vcombine.low %v2222_v47, %v2231_v56 }
  0x31   :  { %v648_v28 = vsel %vm2390_vm6, %v646_v0, %v647_v7  ;;  %v1871_v30 = vcombine.low %v638_v10, %v641_v62  ;;  %v1861_v12 = vrot.slane %v592_v5, 9  ;;  %v653_v15 = vrot.slane %v651_v42, 4 }
  0x32   :  { %v1872_v9 = vcombine.low %v645_v1, %v648_v28  ;;  %v654_v16 = vrot.slane %v2356_v44, 5  ;;  %v661_v18 = vrot.slane %v2177_v14, 5  ;;  %v1862_v19 = vrot.slane %v593_v8, 9 }
  0x33   :  { %1959 = vmatmul.mubr.msk.bf16.gmra.mxu1 %vm292_vm2, %v1843_v51  ;;  %v660_v20 = vrot.slane %v658_v6, 4  ;;  %vm2094_vm7 = vmmov 0   ;;  %v652_v13 = vsel %vm2390_vm6, %v1861_v12, %v651_v42  ;;  %v665_v14 = vrot.slane %v2231_v56, 5 }
  0x34   :  { %1962 = vmatprep.mubr.msk.bf16.mxu1 %vm292_vm2, %v1844_v54  ;;  %v655_v47 = vsel %vm2390_vm6, %v653_v15, %v654_v16  ;;  %v659_v44 = vsel %vm2390_vm6, %v1862_v19, %v658_v6  ;;  %vm896_vm8 = vcmask 64512   ;;  %v1863_v27 = vrot.slane %v594_v21, 9 }
  0x35   :  { %1971 = vmatmul.mubr.msk.bf16.vlgmr.msra.gmra.mxu0 %vm292_vm2, %v1869_v36  ;;  %v662_v4 = vsel %vm2390_vm6, %v660_v20, %v661_v18  ;;  %v1873_v24 = vcombine.low %v652_v13, %v655_v47  ;;  %v667_v3 = vrot.slane %v665_v14, 4  ;;  %v668_v56 = vrot.slane %v2241_v59, 5  ;;  %v972_v59 = vld [vmem:[%s3007_s6 + $0x8] sm:$0xf] }
  0x36   :  { %1974 = vmatprep.mubr.msk.bf16.mxu0 %vm292_vm2, %v1870_v55  ;;  %v1874_v33 = vcombine.low %v659_v44, %v662_v4  ;;  %v666_v29 = vsel %vm2390_vm6, %v1863_v27, %v665_v14  ;;  %vm977_vm9 = vcmask 1043456   ;;  %v1887_v55 = vld [vmem:[%s3006_s5] ss:$0 sm:$0xff]  ;;  %vm973_vm10 = vcmask 97280  }
  0x37   :  { %v669_v2 = vsel %vm2390_vm6, %v667_v3, %v668_v56  ;;  %v2095_v14 = vmov 1966171168   ;;  %v1056_v4 = vlaneseq  ;;  %vm1157_vm11 = vcmask 130048  }
  0x38   :  { %v1875_v31 = vcombine.low %v666_v29, %v669_v2  ;;  %v1054_v44 = vunpack.c.l.s4 %v2095_v14  ;;  %vm1233_vm12 = vcmask 130112   ;;  %vm1298_vm13 = vcmask 1041409  }
  0x39   :  { %vm1300_vm14 = vcmask 1042434   ;;  %vm1302_vm15 = vcmask 1043459   ;;  %vm1304_vm0 = vcmask 1044484   ;;  %vm1306_vm1 = vcmask 1045509  }
  0x3a   :  { %vm1310_vm3 = vcmask 1047559  }
  0x3b   :  { %1963 = vmatmul.mubr.msk.bf16.gmra.mxu1 %vm292_vm2, %v1845_v48 }
  0x3c   :  { %1988 = vmatprep.mubr.msk.f32.mxu1 %vm2094_vm7, %v2093_v52 }
  0x3d   :  { %1975 = vmatmul.mubr.msk.bf16.gmra.mxu0 %vm292_vm2, %v1871_v30 }
  0x3e   :  { %1978 = vmatprep.mubr.msk.bf16.mxu0 %vm292_vm2, %v1872_v9 }
  0x43   :  { %1989 = vmatmul.mubr.msk.f32.vlgmr.msra.gmra.mxu1 %vm896_vm8, %v887_v26  ;;  %v2535_v26 = vshrl.u32 %v1056_v4, 7 }
  0x44   :  { %1995 = vmatprep.mubr.msk.f32.mxu1 %vm2094_vm7, %v2093_v52  ;;  %1992 = vmatpush3.msk.msra.mxu1 %vm977_vm9, %v972_v59 }
  0x45   :  { %1979 = vmatmul.mubr.msk.bf16.gmra.mxu0 %vm292_vm2, %v1873_v24  ;;  %1993 = vmatprep.subr.mxu1 %v2093_v52  ;;  %v1055_v24 = vunpack.c.0.s8 %v1054_v44 }
  0x46   :  { %1982 = vmatprep.mubr.msk.bf16.mxu0 %vm292_vm2, %v1874_v33  ;;  %1994 = vmatpush3.msra.mxu1 %v971_v25 }
  0x47   :  { %v2538_v29 = vsub.s32 %v1055_v24, %v2535_v26 }
  0x4d   :  { %1983 = vmatmul.mubr.msk.bf16.gmra.mxu0 %vm292_vm2, %v1875_v31  ;;  %vm1308_vm2 = vcmask 1046534  }
  0xd6   :  { %v1932_v7 = vpop.f32.mrf.mxu0 }
  0xd8   :  { %v351_v10 = vpop.f32.mrf.mxu0 }
  0xda   :  { %v1933_v62 = vpop.f32.mrf.mxu0 }
  0xdb   :  { %v1944_v32 = vpop.f32.mrf.mxu1 }
  0xdc   :  { %v354_v42 = vpop.f32.mrf.mxu0 }
  0xdd   :  { %v399_v34 = vpop.f32.mrf.mxu1 }
  0xdf   :  { %v1945_v22 = vpop.f32.mrf.mxu1 }
  0xe1   :  { %v402_v35 = vpop.f32.mrf.mxu1 }
  0xe3   :  { %v1952_v37 = vpop.f32.mrf.mxu1 }
  0xe4   :  { %v1936_v1 = vpop.f32.mrf.mxu0  ;;  %v533_v2 = vadd.f32 %v1952_v37, %v1932_v7  ;;  %v2552_v37 = vsub.s32 0, %v2535_v26 }
  0xe5   :  { %v524_v38 = vpop.f32.mrf.mxu1 }
  0xe6   :  { %v367_v28 = vpop.f32.mrf.mxu0  ;;  %v525_v33 = vadd.f32 %v524_v38, %v351_v10 }
  0xe7   :  { %v1953_v39 = vpop.f32.mrf.mxu1 }
  0xe8   :  { %v2522_v5 = vpop.f32.mrf.mxu0  ;;  %v536_v25 = vadd.f32 %v1953_v39, %v1933_v62 }
  0xe9   :  { %v527_v40 = vpop.f32.mrf.mxu1 }
  0xea   :  { %v370_v6 = vpop.f32.mrf.mxu0  ;;  %v528_v3 = vadd.f32 %v527_v40, %v354_v42 }
  0xeb   :  { %v2497_v50 = vpop.f32.mrf.mxu1 }
  0xed   :  { %v540_v43 = vpop.f32.mrf.mxu1  ;;  %v2524_v48 = vpop.f32.mrf.mxu0 }
  0xef   :  { %v2499_v23 = vpop.f32.mrf.mxu1  ;;  %v383_v8 = vpop.f32.mrf.mxu0 }
  0xf1   :  { %v2501_v41 = vpop.f32.mrf.mxu1  ;;  %v2526_v30 = vpop.f32.mrf.mxu0 }
  0xf3   :  { %v2503_v52 = vpop.f32.mrf.mxu1  ;;  %v386_v9 = vpop.f32.mrf.mxu0 }
  0xf5   :  { %v2505_v45 = vpop.f32.mrf.mxu1  ;;  %v1972_v12 = vpop.f32.mrf.mxu0 }
  0xf7   :  { %v2507_v11 = vpop.f32.mrf.mxu1  ;;  %v769_v15 = vpop.f32.mrf.mxu0 }
  0xf8   :  { %v832_v56 = vadd.f32 %v769_v15, %v525_v33 }
  0xf9   :  { %v2509_v46 = vpop.f32.mrf.mxu1  ;;  %v1973_v16 = vpop.f32.mrf.mxu0 }
  0xfb   :  { %v1964_v17 = vpop.f32.mrf.mxu1  ;;  %v772_v18 = vpop.f32.mrf.mxu0 }
  0xfc   :  { %v2511_v49 = vadd.f32 %v1964_v17, %v1944_v32  ;;  %v833_v31 = vadd.f32 %v772_v18, %v528_v3  ;;  %v541_v32 = vadd.f32 %v540_v43, %v367_v28  ;;  %v549_v18 = vadd.f32 %v2497_v50, %v1936_v1 }
  0xfd   :  { %v572_v61 = vpop.f32.mrf.mxu1  ;;  %v2528_v19 = vpop.f32.mrf.mxu0 }
  0xfe   :  { %v2513_v51 = vadd.f32 %v572_v61, %v399_v34  ;;  %v834_v34 = vadd.f32 %v1972_v12, %v533_v2  ;;  %v835_v61 = vadd.f32 %v1973_v16, %v536_v25 }
  0xff   :  { %v1965_v53 = vpop.f32.mrf.mxu1  ;;  %v785_v20 = vpop.f32.mrf.mxu0 }
 0x100   :  { %v2515_v36 = vadd.f32 %v1965_v53, %v1945_v22  ;;  %v2545_v22 = vld [vmem:[%s3003_s2] ss:$0 sm:$0xff]  ;;  %v836_v43 = vadd.f32 %v785_v20, %v541_v32  ;;  %v565_v32 = vadd.f32 %v2503_v52, %v2524_v48  ;;  %s2097_s2 = smov [#allocation2]  }
 0x101   :  { %v575_v54 = vpop.f32.mrf.mxu1  ;;  %v2530_v13 = vpop.f32.mrf.mxu0  ;;  %v2548_v38 = vadd.f32 %v2545_v22, %v832_v56  ;;  %v2555_v39 = vadd.f32 %v2545_v22, %v833_v31  ;;  %v2567_v28 = vadd.f32 %v2545_v22, %v835_v61  ;;  %v838_v56 = vadd.f32 %v2528_v19, %v549_v18  ;;  %s1808_s13 = sshll.u32 %s2097_s2, 4  ;;  %s1809_s13 = int_to_ptr.vmem [resolvable:$true] %s1808_s13 }
 0x102   :  { %v2520_v57 = vadd.f32 %v575_v54, %v402_v35  ;;  %s2071_s14 = scalar_lea.vmem %s1809_s13, 128  ;;  %p2076_p1 = scmp.lt.s32.totalorder %s1809_s13, %s1809_s13 }
 0x103   :  { %v966_v58 = vpop.f32.mrf.mxu1  ;;  %v788_v47 = vpop.f32.mrf.mxu0  ;;  %v3018_v7 = vmax.f32 %v2548_v38, 0.0  ;;  %v3024_v3 = vmax.f32 %v2567_v28, 0.0  ;;  %p2072_p0 = scmp.ne.s32.totalorder %s1809_s13, %s2071_s14  ;;  %p2077_p2 = scmp.lt.s32.totalorder %s2071_s14, %s2071_s14 }
 0x104   :  { %v967_v60 = vadd.f32 %v1887_v55, %v966_v58 }
 0x105   :  { %v1990_v63 = vpop.f32.mrf.mxu1  ;;  %v2532_v21 = vpop.f32.mrf.mxu0  ;;  %p2078_p3 = por %p2077_p2, %p2076_p1 }
 0x106   :  { %v970_v0 = vmax.f32 %v967_v60, 0.0  ;;  %v544_v60 = vadd.f32 %v2501_v41, %v370_v6  ;;  %v2560_v63 = vadd.f32 %v2545_v22, %v834_v34  ;;  %v3022_v41 = vmax.f32 %v2555_v39, 0.0 }
 0x107   :  { %v801_v27 = vpop.f32.mrf.mxu0  ;;  %v2572_v6 = vadd.f32 %v2545_v22, %v836_v43  ;;  %v842_v43 = vadd.f32 %v2532_v21, %v565_v32  ;;  %p2079_p4 = pnand %p2078_p3, %p2072_p0 }
 0x108   :  { %1996 = vmatmul.mubr.msk.f32.vlgmr.msra.gmra.mxu1 %vm973_vm10, %v970_v0  ;;  %v557_v0 = vadd.f32 %v2505_v45, %v383_v8  ;;  %v837_v12 = vadd.f32 %v788_v47, %v544_v60  ;;  %v3021_v20 = vmax.f32 %v2560_v63, 0.0  ;;  %v560_v47 = vadd.f32 %v2509_v46, %v386_v9 }
 0x109   :  { %v2540_v59 = vpop.f32.mrf.mxu0  ;;  %v552_v9 = vadd.f32 %v2499_v23, %v2522_v5  ;;  %v3019_v2 = vmax.f32 %v2572_v6, 0.0 }
 0x10a   :  { %v840_v45 = vadd.f32 %v801_v27, %v557_v0  ;;  %v2591_v50 = vadd.f32 %v2545_v22, %v837_v12 }
 0x10b   :  { %v804_v54 = vpop.f32.mrf.mxu0  ;;  %v839_v61 = vadd.f32 %v2530_v13, %v552_v9 }
 0x10c   :  { %v841_v1 = vadd.f32 %v804_v54, %v560_v47  ;;  %v2600_v31 = vadd.f32 %v2545_v22, %v840_v45  ;;  %v3023_v52 = vmax.f32 %v2591_v50, 0.0 }
 0x10d   :  { %v2574_v8 = vpop.f32.mrf.mxu0 }
 0x10e   :  { %v2615_v48 = vadd.f32 %v2545_v22, %v841_v1  ;;  %v3015_v54 = vmax.f32 %v2600_v31, 0.0 }
 0x10f   :  { %v817_v25 = vpop.f32.mrf.mxu0 }
 0x110   :  { %v844_v45 = vadd.f32 %v817_v25, %v2513_v51 }
 0x112   :  { %v2660_v9 = vadd.f32 %v2545_v22, %v844_v45 }
 0x1c8   :  { %v1047_v35 = vpop.f32.mrf.mxu1 }
 0x1c9   :  { %v1052_v40 = vcombine.high %v1047_v35, %v1047_v35  ;;  %v1059_v17 = vrot.slane %v1047_v35, %v2538_v29 }
 0x1ca   :  { %v1997_v53 = vpop.f32.mrf.mxu1 }
 0x1cb   :  { %v1067_v55 = vcombine.high %v1059_v17, %v1059_v17  ;;  %v1075_v58 = vrot.slane %v1059_v17, %v2538_v29  ;;  %v1066_v10 = vrot.slane %v1052_v40, %v2538_v29  ;;  %v2618_v53 = vadd.f32 %v2545_v22, %v838_v56 }
 0x1cd   :  { %v1097_v62 = vcombine.high %v1075_v58, %v1075_v58  ;;  %v1104_v42 = vrot.slane %v1075_v58, %v2552_v37  ;;  %v1089_v15 = vrot.slane %v1067_v55, %v2538_v29  ;;  %v2583_v44 = vrot.slane %v1066_v10, %v2538_v29  ;;  %v1985_v55 = vpop.f32.mrf.mxu0 }
 0x1ce   :  { %v1068_v34 = vcombine.high %v1066_v10, %v1066_v10  ;;  %v568_v58 = vadd.f32 %v2507_v11, %v2526_v30  ;;  %v3016_v30 = vmax.f32 %v2615_v48, 0.0  ;;  %v3017_v12 = vmax.f32 %v2618_v53, 0.0 }
 0x1cf   :  { %v1141_v16 = vmul.f32 %v1104_v42, %v3018_v7  ;;  %v1108_v14 = vrot.slane %v1089_v15, %v2552_v37  ;;  %v1142_v33 = vmul.f32 %v1104_v42, %v3022_v41  ;;  %v1112_v27 = vrot.slane %v1097_v62, %v2552_v37 }
 0x1d0   :  { %v1120_v19 = vrot.slane %v2583_v44, %v2552_v37  ;;  %v1099_v17 = vcombine.high %v1089_v15, %v1089_v15  ;;  %v1096_v21 = vrot.slane %v1068_v34, %v2538_v29  ;;  %v2633_v42 = vadd.f32 %v2545_v22, %v839_v61 }
 0x1d1   :  { %v1158_v24 = vsel %vm1157_vm11, %v1141_v16, 0.0  ;;  %v1143_v46 = vmul.f32 %v1108_v14, %v3021_v20  ;;  %v1144_v40 = vmul.f32 %v1108_v14, %v3024_v3  ;;  %v1161_v23 = vsel %vm1157_vm11, %v1142_v33, 0.0  ;;  %v820_v16 = vpop.f32.mrf.mxu0 }
 0x1d2   :  { %1159 = vadd.xlane.f32.xlu0 %v1158_v24  ;;  %v1145_v5 = vmul.f32 %v1112_v27, %v3019_v2  ;;  %v1146_v13 = vmul.f32 %v1112_v27, %v3023_v52  ;;  %v1149_v10 = vmul.f32 %v1120_v19, %v3015_v54  ;;  %v1116_v62 = vrot.slane %v1099_v17, %v2552_v37 }
 0x1d3   :  { %v1164_v35 = vsel %vm1157_vm11, %v1143_v46, 0.0  ;;  %v1167_v60 = vsel %vm1157_vm11, %v1144_v40, 0.0  ;;  %v843_v11 = vadd.f32 %v2540_v59, %v568_v58  ;;  %v2639_v15 = vadd.f32 %v2545_v22, %v842_v43 }
 0x1d4   :  { %1165 = vadd.xlane.f32.xlu1 %v1164_v35  ;;  %v1170_v0 = vsel %vm1157_vm11, %v1145_v5, 0.0  ;;  %v1173_v18 = vsel %vm1157_vm11, %v1146_v13, 0.0  ;;  %v1150_v29 = vmul.f32 %v1120_v19, %v3016_v30  ;;  %v1182_v47 = vsel %vm1157_vm11, %v1149_v10, 0.0 }
 0x1d5   :  { %v1147_v59 = vmul.f32 %v1116_v62, %v3017_v12  ;;  %v1124_v14 = vrot.slane %v1096_v21, %v2552_v37  ;;  %v1098_v24 = vcombine.high %v2583_v44, %v2583_v44  ;;  %v3020_v33 = vmax.f32 %v2633_v42, 0.0 }
 0x1d6   :  { %1162 = vadd.xlane.f32.xlu0 %v1161_v23  ;;  %v2653_v51 = vadd.f32 %v2545_v22, %v843_v11  ;;  %v845_v27 = vadd.f32 %v820_v16, %v2520_v57  ;;  %v3014_v1 = vmax.f32 %v2639_v15, 0.0  ;;  %v846_v46 = vadd.f32 %v2574_v8, %v2511_v49 }
 0x1d7   :  { %v1185_v56 = vsel %vm1157_vm11, %v1150_v29, 0.0  ;;  %v1148_v44 = vmul.f32 %v1116_v62, %v3020_v33  ;;  %v1176_v25 = vsel %vm1157_vm11, %v1147_v59, 0.0  ;;  %v1128_v32 = vrot.slane %v1098_v24, %v2552_v37 }
 0x1d8   :  { %1168 = vadd.xlane.f32.xlu1 %v1167_v60  ;;  %v1151_v57 = vmul.f32 %v1124_v14, %v3014_v1  ;;  %v1100_v34 = vcombine.high %v1096_v21, %v1096_v21  ;;  %v3013_v35 = vmax.f32 %v2653_v51, 0.0  ;;  %v847_v49 = vadd.f32 %v1985_v55, %v2515_v36 }
 0x1d9   :  { %v2672_v8 = vadd.f32 %v2545_v22, %v845_v27  ;;  %v2675_v40 = vadd.f32 %v2545_v22, %v846_v46  ;;  %v3012_v23 = vmax.f32 %v2660_v9, 0.0  ;;  %v1179_v5 = vsel %vm1157_vm11, %v1148_v44, 0.0 }
 0x1da   :  { %1171 = vadd.xlane.f32.xlu0 %v1170_v0  ;;  %v1152_v19 = vmul.f32 %v1124_v14, %v3013_v35  ;;  %v1188_v17 = vsel %vm1157_vm11, %v1151_v57, 0.0  ;;  %v1132_v61 = vrot.slane %v1100_v34, %v2552_v37  ;;  %v2686_v43 = vadd.f32 %v2545_v22, %v847_v49 }
 0x1db   :  { %v1153_v36 = vmul.f32 %v1128_v32, %v3012_v23  ;;  %v3011_v55 = vmax.f32 %v2672_v8, 0.0  ;;  %v3010_v58 = vmax.f32 %v2675_v40, 0.0  ;;  %v1223_v24 = vand.u32 127, %v1056_v4 }
 0x1dc   :  { %1174 = vadd.xlane.f32.xlu1 %v1173_v18  ;;  %v1191_v60 = vsel %vm1157_vm11, %v1152_v19, 0.0  ;;  %v3009_v62 = vmax.f32 %v2686_v43, 0.0  ;;  %v3027_v23 = vsub.s32 3, %v2535_v26 }
 0x1dd   :  { %v1154_v13 = vmul.f32 %v1128_v32, %v3011_v55  ;;  %v1194_v0 = vsel %vm1157_vm11, %v1153_v36, 0.0  ;;  %v1155_v10 = vmul.f32 %v1132_v61, %v3010_v58  ;;  %v1228_v46 = vadd.s32 4294967288, %v1223_v24 }
 0x1de   :  { %1183 = vadd.xlane.f32.xlu0 %v1182_v47  ;;  %v1156_v21 = vmul.f32 %v1132_v61, %v3009_v62  ;;  %v2727_v32 = vsub.s32 %v1223_v24, %v2535_v26 }
 0x1df   :  { %v1197_v22 = vsel %vm1157_vm11, %v1154_v13, 0.0  ;;  %v1200_v11 = vsel %vm1157_vm11, %v1155_v10, 0.0 }
 0x1e0   :  { %1186 = vadd.xlane.f32.xlu1 %v1185_v56  ;;  %v1203_v45 = vsel %vm1157_vm11, %v1156_v21, 0.0 }
 0x1e2   :  { %1177 = vadd.xlane.f32.xlu0 %v1176_v25  ;;  %v2722_v25 = vsub.s32 %v1228_v46, %v2535_v26 }
 0x1e4   :  { %1180 = vadd.xlane.f32.xlu1 %v1179_v5 }
 0x1e6   :  { %1189 = vadd.xlane.f32.xlu0 %v1188_v17 }
 0x1e8   :  { %1192 = vadd.xlane.f32.xlu1 %v1191_v60 }
 0x1ea   :  { %1195 = vadd.xlane.f32.xlu0 %v1194_v0 }
 0x1ec   :  { %1198 = vadd.xlane.f32.xlu1 %v1197_v22 }
 0x1ee   :  { %1201 = vadd.xlane.f32.xlu0 %v1200_v11 }
 0x1f0   :  { %1204 = vadd.xlane.f32.xlu1 %v1203_v45 }
 0x25b   :  { %v2702_v16 = vpop.xlane.xlu0 %1159 }
 0x25c   :  { %v1227_v60 = vrot.slane %v2702_v16, %v2727_v32 }
 0x25d   :  { %v2704_v18 = vpop.xlane.xlu1 %1165 }
 0x25e   :  { %v1238_v5 = vrot.slane %v2704_v18, %v2727_v32 }
 0x25f   :  { %v2706_v29 = vpop.xlane.xlu0 %1162 }
 0x260   :  { %v1232_v19 = vrot.slane %v2706_v29, %v2722_v25 }
 0x261   :  { %v2708_v47 = vpop.xlane.xlu1 %1168 }
 0x262   :  { %v1242_v34 = vrot.slane %v2708_v47, %v2722_v25  ;;  %v1234_v21 = vsel %vm1233_vm12, %v1232_v19, %v1227_v60 }
 0x263   :  { %v2710_v59 = vpop.xlane.xlu0 %1171 }
 0x264   :  { %v1247_v36 = vrot.slane %v2710_v59, %v2727_v32  ;;  %v1243_v13 = vsel %vm1233_vm12, %v1242_v34, %v1238_v5 }
 0x265   :  { %v2712_v14 = vpop.xlane.xlu1 %1174  ;;  %v1299_v24 = vsel %vm1298_vm13, %v1243_v13, %v1234_v21 }
 0x266   :  { %v1251_v4 = vrot.slane %v2712_v14, %v2722_v25 }
 0x267   :  { %v2715_v27 = vpop.xlane.xlu0 %1183 }
 0x268   :  { %v1252_v22 = vsel %vm1233_vm12, %v1251_v4, %v1247_v36 }
 0x269   :  { %v2717_v56 = vpop.xlane.xlu1 %1186  ;;  %v1301_v5 = vsel %vm1300_vm14, %v1252_v22, %v1299_v24 }
 0x26a   :  { %v1269_v46 = vrot.slane %v2717_v56, %v2722_v25 }
 0x26b   :  { %v2719_v44 = vpop.xlane.xlu0 %1177 }
 0x26c   :  { %v1256_v0 = vrot.slane %v2719_v44, %v2727_v32 }
 0x26d   :  { %v2724_v57 = vpop.xlane.xlu1 %1180 }
 0x26e   :  { %v1260_v17 = vrot.slane %v2724_v57, %v2722_v25 }
 0x26f   :  { %v2731_v49 = vpop.xlane.xlu0 %1189 }
 0x270   :  { %v1261_v11 = vsel %vm1233_vm12, %v1260_v17, %v1256_v0  ;;  %v1274_v4 = vrot.slane %v2731_v49, %v2727_v32  ;;  %v1265_v17 = vrot.slane %v2715_v27, %v2727_v32 }
 0x271   :  { %v2743_v61 = vpop.xlane.xlu1 %1192  ;;  %v1303_v36 = vsel %vm1302_vm15, %v1261_v11, %v1301_v5 }
 0x272   :  { %v1278_v45 = vrot.slane %v2743_v61, %v2722_v25  ;;  %v1270_v22 = vsel %vm1233_vm12, %v1269_v46, %v1265_v17  ;;  %v2096_v17 = vmov 0  }
 0x273   :  { %v2750_v10 = vpop.xlane.xlu0 %1195  ;;  %v1305_v5 = vsel %vm1304_vm0, %v1270_v22, %v1303_v36  ;;  %2008 = vset.pattern.permute.xlu0 %v2096_v17  ;;  %2007 = vset.pattern.permute.xlu1 %v2096_v17 }
 0x274   :  { %v1283_v60 = vrot.slane %v2750_v10, %v2727_v32  ;;  %v1279_v0 = vsel %vm1233_vm12, %v1278_v45, %v1274_v4 }
 0x275   :  { %v2760_v34 = vpop.xlane.xlu1 %1198  ;;  %v1307_v58 = vsel %vm1306_vm1, %v1279_v0, %v1305_v5  ;;  %v3025_v5 = vsub.s32 6, %v2535_v26 }
 0x276   :  { %v1287_v19 = vrot.slane %v2760_v34, %v2722_v25 }
 0x277   :  { %v2772_v13 = vpop.xlane.xlu0 %1201 }
 0x278   :  { %v1288_v24 = vsel %vm1233_vm12, %v1287_v19, %v1283_v60  ;;  %v1292_v62 = vrot.slane %v2772_v13, %v2727_v32  ;;  %v1323_v60 = vsub.s32 1, %v2535_v26 }
 0x279   :  { %v2776_v21 = vpop.xlane.xlu1 %1204  ;;  %v1309_v46 = vsel %vm1308_vm2, %v1288_v24, %v1307_v58  ;;  %v1327_v24 = vsub.s32 2, %v2535_v26 }
 0x27a   :  { %v1296_v11 = vrot.slane %v2776_v21, %v2722_v25 }
 0x27c   :  { %v1297_v45 = vsel %vm1233_vm12, %v1296_v11, %v1292_v62  ;;  %v3026_v62 = vsub.s32 5, %v2535_v26 }
 0x27d   :  { %v1311_v4 = vsel %vm1310_vm3, %v1297_v45, %v1309_v46 }
 0x27e   :  { %v1313_v19 = vsel %vm1157_vm11, %v1311_v4, -inf }
 0x27f   :  { %1314 = vmax.xlane.f32.xlu0 %v1313_v19 }
 0x308   :  { %v1315_v55 = vpop.xlane.xlu0 %1314 }
 0x309   :  { %v1320_v36 = vrot.slane %v1315_v55, %v2552_v37  ;;  %v1324_v0 = vrot.slane %v1315_v55, %v1323_v60  ;;  %v2801_v45 = vrot.slane %v1315_v55, %v3026_v62  ;;  %v1328_v19 = vrot.slane %v1315_v55, %v1327_v24 }
 0x30b   :  { %v1357_v58 = vsub.f32 %v2702_v16, %v1320_v36  ;;  %v1358_v22 = vsub.f32 %v2706_v29, %v1320_v36  ;;  %v1359_v11 = vsub.f32 %v2704_v18, %v1324_v0  ;;  %v1360_v17 = vsub.f32 %v2708_v47, %v1324_v0 }
 0x30c   :  { %v1347_v29 = vsub.s32 7, %v2535_v26  ;;  %v1344_v18 = vrot.slane %v1315_v55, %v3025_v5  ;;  %v1367_v36 = vsub.f32 %v2731_v49, %v2801_v45 }
 0x30d   :  { %v1373_v46 = vmul.f32 1.442695, %v1357_v58  ;;  %v1375_v4 = vmul.f32 1.442695, %v1358_v22  ;;  %v1377_v16 = vmul.f32 1.442695, %v1359_v11  ;;  %v1361_v58 = vsub.f32 %v2710_v59, %v1328_v19 }
 0x30e   :  { %v1379_v22 = vmul.f32 1.442695, %v1360_v17  ;;  %v1348_v47 = vrot.slane %v1315_v55, %v1347_v29  ;;  %v1369_v0 = vsub.f32 %v2750_v10, %v1344_v18  ;;  %v1393_v11 = vmul.f32 1.442695, %v1367_v36 }
 0x30f   :  { %2023 = vpow2.f32 %v1373_v46  ;;  %v1332_v46 = vrot.slane %v1315_v55, %v3027_v23  ;;  %v1381_v35 = vmul.f32 1.442695, %v1361_v58  ;;  %v1335_v59 = vsub.s32 4, %v2535_v26 }
 0x310   :  { %2025 = vpow2.f32 %v1375_v4  ;;  %v1362_v4 = vsub.f32 %v2712_v14, %v1328_v19  ;;  %v1371_v49 = vsub.f32 %v2772_v13, %v1348_v47  ;;  %v1397_v1 = vmul.f32 1.442695, %v1369_v0 }
 0x311   :  { %2027 = vpow2.f32 %v1377_v16  ;;  %v1363_v17 = vsub.f32 %v2719_v44, %v1332_v46  ;;  %v1336_v14 = vrot.slane %v1315_v55, %v1335_v59  ;;  %v1364_v13 = vsub.f32 %v2724_v57, %v1332_v46 }
 0x312   :  { %2029 = vpow2.f32 %v1379_v22  ;;  %v1383_v16 = vmul.f32 1.442695, %v1362_v4  ;;  %v1401_v36 = vmul.f32 1.442695, %v1371_v49  ;;  %v1370_v49 = vsub.f32 %v2760_v34, %v1344_v18 }
 0x313   :  { %2031 = vpow2.f32 %v1393_v11  ;;  %v1385_v19 = vmul.f32 1.442695, %v1363_v17  ;;  %v1366_v55 = vsub.f32 %v2717_v56, %v1336_v14 }
 0x314   :  { %2033 = vpow2.f32 %v1381_v35  ;;  %v1365_v35 = vsub.f32 %v2715_v27, %v1336_v14  ;;  %v1368_v27 = vsub.f32 %v2743_v61, %v2801_v45  ;;  %v1372_v61 = vsub.f32 %v2776_v21, %v1348_v47 }
 0x315   :  { %2035 = vpow2.f32 %v1397_v1  ;;  %v1387_v1 = vmul.f32 1.442695, %v1364_v13  ;;  %v1391_v46 = vmul.f32 1.442695, %v1366_v55  ;;  %v1399_v45 = vmul.f32 1.442695, %v1370_v49 }
 0x316   :  { %2037 = vpow2.f32 %v1383_v16  ;;  %v1389_v57 = vmul.f32 1.442695, %v1365_v35  ;;  %v1395_v17 = vmul.f32 1.442695, %v1368_v27  ;;  %v1403_v14 = vmul.f32 1.442695, %v1372_v61 }
 0x317   :  { %2039 = vpow2.f32 %v1401_v36 }
 0x318   :  { %2041 = vpow2.f32 %v1385_v19 }
 0x319   :  { %2043 = vpow2.f32 %v1387_v1 }
 0x31a   :  { %2045 = vpow2.f32 %v1389_v57 }
 0x31b   :  { %2047 = vpow2.f32 %v1391_v46 }
 0x31c   :  { %v2822_v54 = vpop.eup %2023  ;;  %2049 = vpow2.f32 %v1395_v17 }
 0x31d   :  { %v2824_v10 = vpop.eup %2025  ;;  %1422 = vperm.xlu1 %2007, %v2822_v54   ;;  %2051 = vpow2.f32 %v1399_v45 }
 0x31e   :  { %1425 = vperm.xlu0 %2008, %v2824_v10   ;;  %v2831_v44 = vpop.eup %2027  ;;  %2053 = vpow2.f32 %v1403_v14 }
 0x31f   :  { %v2835_v58 = vpop.eup %2029 }
 0x320   :  { %v2838_v22 = vpop.eup %2031 }
 0x321   :  { %1428 = vperm.xlu1 %2007, %v2831_v44   ;;  %v2842_v0 = vpop.eup %2033 }
 0x322   :  { %1452 = vperm.xlu0 %2008, %v2838_v22   ;;  %v2845_v11 = vpop.eup %2035 }
 0x323   :  { %v2850_v4 = vpop.eup %2037 }
 0x324   :  { %v2853_v56 = vpop.eup %2039 }
 0x325   :  { %1431 = vperm.xlu1 %2007, %v2835_v58   ;;  %v2857_v16 = vpop.eup %2041 }
 0x326   :  { %1458 = vperm.xlu0 %2008, %v2845_v11   ;;  %v2861_v36 = vpop.eup %2043 }
 0x327   :  { %v2864_v13 = vpop.eup %2045 }
 0x328   :  { %v2867_v34 = vpop.eup %2047 }
 0x329   :  { %1434 = vperm.xlu1 %2007, %v2842_v0   ;;  %v2870_v18 = vpop.eup %2049 }
 0x32a   :  { %1464 = vperm.xlu0 %2008, %v2853_v56   ;;  %v2873_v21 = vpop.eup %2051 }
 0x32b   :  { %v2876_v47 = vpop.eup %2053 }
 0x32d   :  { %1437 = vperm.xlu1 %2007, %v2850_v4  }
 0x331   :  { %1440 = vperm.xlu1 %2007, %v2857_v16  }
 0x335   :  { %1443 = vperm.xlu1 %2007, %v2861_v36  }
 0x339   :  { %1446 = vperm.xlu1 %2007, %v2864_v13  }
 0x33d   :  { %1449 = vperm.xlu1 %2007, %v2867_v34  }
 0x341   :  { %1455 = vperm.xlu1 %2007, %v2870_v18  }
 0x345   :  { %1461 = vperm.xlu1 %2007, %v2873_v21  }
 0x349   :  { %1467 = vperm.xlu1 %2007, %v2876_v47  }
 0x398   :  { %v1423_v19 = vpop.permute.xlu1 %1422 }
 0x399   :  { %v1426_v46 = vpop.permute.xlu0 %1425  ;;  %v1472_v33 = vrot.slane %v1423_v19, %v2727_v32 }
 0x39a   :  { %v1476_v2 = vrot.slane %v1426_v46, %v2722_v25 }
 0x39c   :  { %v1429_v35 = vpop.permute.xlu1 %1428  ;;  %v1477_v19 = vsel %vm1233_vm12, %v1476_v2, %v1472_v33 }
 0x39d   :  { %v1453_v61 = vpop.permute.xlu0 %1452  ;;  %v1481_v20 = vrot.slane %v1429_v35, %v2727_v32 }
 0x39e   :  { %v1517_v35 = vrot.slane %v1453_v61, %v2727_v32 }
 0x3a0   :  { %v1432_v1 = vpop.permute.xlu1 %1431 }
 0x3a1   :  { %v1485_v14 = vrot.slane %v1432_v1, %v2722_v25  ;;  %v1459_v30 = vpop.permute.xlu0 %1458 }
 0x3a3   :  { %v1486_v5 = vsel %vm1233_vm12, %v1485_v14, %v1481_v20 }
 0x3a4   :  { %v1435_v55 = vpop.permute.xlu1 %1434  ;;  %v1541_v20 = vsel %vm1298_vm13, %v1486_v5, %v1477_v19 }
 0x3a5   :  { %v1490_v52 = vrot.slane %v1435_v55, %v2727_v32 }
 0x3a8   :  { %v1438_v57 = vpop.permute.xlu1 %1437 }
 0x3a9   :  { %v1494_v12 = vrot.slane %v1438_v57, %v2722_v25 }
 0x3ab   :  { %v1495_v57 = vsel %vm1233_vm12, %v1494_v12, %v1490_v52 }
 0x3ac   :  { %v1441_v27 = vpop.permute.xlu1 %1440  ;;  %v1542_v52 = vsel %vm1300_vm14, %v1495_v57, %v1541_v20 }
 0x3ad   :  { %v1499_v1 = vrot.slane %v1441_v27, %v2727_v32  ;;  %v1465_v27 = vpop.permute.xlu0 %1464 }
 0x3b0   :  { %v1444_v49 = vpop.permute.xlu1 %1443 }
 0x3b1   :  { %v1503_v41 = vrot.slane %v1444_v49, %v2722_v25 }
 0x3b3   :  { %v1504_v49 = vsel %vm1233_vm12, %v1503_v41, %v1499_v1  ;;  %v1535_v41 = vrot.slane %v1465_v27, %v2727_v32 }
 0x3b4   :  { %v1447_v17 = vpop.permute.xlu1 %1446 }
 0x3b5   :  { %v1508_v46 = vrot.slane %v1447_v17, %v2727_v32  ;;  %v1543_v17 = vsel %vm1302_vm15, %v1504_v49, %v1542_v52 }
 0x3b8   :  { %v1450_v45 = vpop.permute.xlu1 %1449 }
 0x3b9   :  { %v1512_v3 = vrot.slane %v1450_v45, %v2722_v25  ;;  %v1526_v45 = vrot.slane %v1459_v30, %v2727_v32 }
 0x3bc   :  { %v1456_v7 = vpop.permute.xlu1 %1455 }
 0x3bd   :  { %v1521_v62 = vrot.slane %v1456_v7, %v2722_v25  ;;  %v1513_v7 = vsel %vm1233_vm12, %v1512_v3, %v1508_v46 }
 0x3bf   :  { %v1522_v12 = vsel %vm1233_vm12, %v1521_v62, %v1517_v35 }
 0x3c0   :  { %v1462_v23 = vpop.permute.xlu1 %1461 }
 0x3c1   :  { %v1530_v55 = vrot.slane %v1462_v23, %v2722_v25  ;;  %v1544_v23 = vsel %vm1304_vm0, %v1513_v7, %v1543_v17 }
 0x3c2   :  { %v1545_v5 = vsel %vm1306_vm1, %v1522_v12, %v1544_v23 }
 0x3c3   :  { %v1531_v2 = vsel %vm1233_vm12, %v1530_v55, %v1526_v45 }
 0x3c4   :  { %v1468_v33 = vpop.permute.xlu1 %1467  ;;  %v1546_v3 = vsel %vm1308_vm2, %v1531_v2, %v1545_v5 }
 0x3c5   :  { %v1539_v30 = vrot.slane %v1468_v33, %v2722_v25 }
 0x3c7   :  { %v1540_v61 = vsel %vm1233_vm12, %v1539_v30, %v1535_v41 }
 0x3c8   :  { %v1547_v14 = vsel %vm1310_vm3, %v1540_v61, %v1546_v3 }
 0x3c9   :  { %v1549_v62 = vsel %vm1157_vm11, %v1547_v14, 0.0 }
 0x3ca   :  { %1550 = vadd.xlane.f32.xlu0 %v1549_v62 }
 0x453   :  { %v1551_v1 = vpop.xlane.xlu0 %1550 }
 0x454   :  { %v1572_v57 = vrot.slane %v1551_v1, %v1335_v59  ;;  %v1556_v32 = vrot.slane %v1551_v1, %v2552_v37  ;;  %v1584_v25 = vrot.slane %v1551_v1, %v1347_v29  ;;  %v1560_v46 = vrot.slane %v1551_v1, %v1323_v60 }
 0x455   :  { %v1564_v19 = vrot.slane %v1551_v1, %v1327_v24  ;;  %v3032_v60 = vsub.s32 3, %v2535_v26 }
 0x456   :  { %2055 = vrcp.f32 %v1572_v57 }
 0x457   :  { %2057 = vrcp.f32 %v1556_v32  ;;  %v1568_v20 = vrot.slane %v1551_v1, %v3032_v60 }
 0x458   :  { %2059 = vrcp.f32 %v1584_v25 }
 0x459   :  { %2061 = vrcp.f32 %v1560_v46 }
 0x45a   :  { %2063 = vrcp.f32 %v1564_v19  ;;  %v3039_v19 = vmax.f32 %v2633_v42, 0.0 }
 0x45b   :  { %2065 = vrcp.f32 %v1568_v20 }
 0x463   :  { %v2056_v35 = vpop.eup %2055 }
 0x464   :  { %v2058_v49 = vpop.eup %2057  ;;  %v1606_v55 = vmul.f32 %v2056_v35, %v2864_v13 }
 0x465   :  { %v2060_v59 = vpop.eup %2059  ;;  %v1594_v37 = vmul.f32 %v2058_v49, %v2822_v54  ;;  %v1595_v45 = vmul.f32 %v2058_v49, %v2824_v10  ;;  %v3040_v49 = vmax.f32 %v2572_v6, 0.0 }
 0x466   :  { %1659 = vperm.xlu0 %2008, %v1606_v55   ;;  %v1615_v29 = vmul.f32 %v2060_v59, %v2853_v56  ;;  %v2062_v27 = vpop.eup %2061  ;;  %v3033_v56 = vsub.s32 5, %v2535_v26 }
 0x467   :  { %1619 = vperm.xlu1 %2007, %v1594_v37   ;;  %v1597_v24 = vmul.f32 %v2062_v27, %v2831_v44  ;;  %v1598_v13 = vmul.f32 %v2062_v27, %v2835_v58  ;;  %v2064_v54 = vpop.eup %2063  ;;  %v3034_v44 = vsub.s32 6, %v2535_v26 }
 0x468   :  { %v1600_v7 = vmul.f32 %v2064_v54, %v2842_v0  ;;  %v1576_v52 = vrot.slane %v1551_v1, %v3033_v56  ;;  %v1601_v10 = vmul.f32 %v2064_v54, %v2850_v4  ;;  %v2066_v12 = vpop.eup %2065  ;;  %v1607_v0 = vmul.f32 %v2056_v35, %v2867_v34 }
 0x469   :  { %v1603_v17 = vmul.f32 %v2066_v12, %v2857_v16  ;;  %v1580_v2 = vrot.slane %v1551_v1, %v3034_v44  ;;  %v1604_v58 = vmul.f32 %v2066_v12, %v2861_v36  ;;  %v1616_v36 = vmul.f32 %v2060_v59, %v2876_v47 }
 0x46a   :  { %1689 = vperm.xlu0 %2008, %v1615_v29   ;;  %2067 = vrcp.f32 %v1576_v52  ;;  %v3038_v47 = vmax.f32 %v2560_v63, 0.0  ;;  %v3042_v29 = vmax.f32 %v2618_v53, 0.0  ;;  %v3044_v63 = vmax.f32 %v2600_v31, 0.0 }
 0x46b   :  { %1624 = vperm.xlu1 %2007, %v1595_v45   ;;  %2069 = vrcp.f32 %v1580_v2 }
 0x46f   :  { %1629 = vperm.xlu1 %2007, %v1597_v24  }
 0x473   :  { %1634 = vperm.xlu1 %2007, %v1598_v13  }
 0x477   :  { %1639 = vperm.xlu1 %2007, %v1600_v7   ;;  %v2068_v33 = vpop.eup %2067 }
 0x478   :  { %v1609_v41 = vmul.f32 %v2068_v33, %v2838_v22  ;;  %v1610_v4 = vmul.f32 %v2068_v33, %v2870_v18  ;;  %v2070_v23 = vpop.eup %2069  ;;  %v3035_v18 = vmax.f32 %v2567_v28, 0.0  ;;  %v3041_v28 = vmax.f32 %v2548_v38, 0.0 }
 0x479   :  { %v1612_v16 = vmul.f32 %v2070_v23, %v2845_v11  ;;  %v1613_v26 = vmul.f32 %v2070_v23, %v2873_v21  ;;  %v3036_v11 = vmax.f32 %v2591_v50, 0.0  ;;  %v3037_v21 = vmax.f32 %v2555_v39, 0.0 }
 0x47a   :  { %v3043_v39 = vmax.f32 %v2615_v48, 0.0  ;;  %v3046_v33 = vmax.f32 %v2653_v51, 0.0 }
 0x47b   :  { %1644 = vperm.xlu1 %2007, %v1601_v10  }
 0x47f   :  { %1649 = vperm.xlu1 %2007, %v1603_v17   ;;  %v3045_v17 = vmax.f32 %v2639_v15, 0.0 }
 0x483   :  { %1654 = vperm.xlu1 %2007, %v1604_v58  }
 0x487   :  { %1664 = vperm.xlu1 %2007, %v1607_v0  }
 0x48b   :  { %1669 = vperm.xlu1 %2007, %v1609_v41  }
 0x48f   :  { %1674 = vperm.xlu1 %2007, %v1610_v4  }
 0x493   :  { %1679 = vperm.xlu1 %2007, %v1612_v16  }
 0x497   :  { %1684 = vperm.xlu1 %2007, %v1613_v26  }
 0x49b   :  { %1694 = vperm.xlu1 %2007, %v1616_v36  }
 0x4e1   :  { %v1660_v32 = vpop.permute.xlu0 %1659 }
 0x4e2   :  { %v1620_v30 = vpop.permute.xlu1 %1619  ;;  %v1705_v20 = vmul.f32 %v1660_v32, %v3044_v63 }
 0x4e3   :  { %v1697_v37 = vmul.f32 %v1620_v30, %v3041_v28 }
 0x4e4   :  { %v1749_v56 = vsel %vm1157_vm11, %v1705_v20, 0.0 }
 0x4e5   :  { %v1713_v48 = vsel %vm1157_vm11, %v1697_v37, 0.0  ;;  %v1690_v51 = vpop.permute.xlu0 %1689 }
 0x4e6   :  { %v1625_v34 = vpop.permute.xlu1 %1624 }
 0x4e7   :  { %v1698_v25 = vmul.f32 %v1625_v34, %v3037_v21  ;;  %v3048_v21 = vmax.f32 %v2672_v8, 0.0 }
 0x4e9   :  { %v1714_v6 = vsel %vm1157_vm11, %v1698_v25, 0.0 }
 0x4ea   :  { %v1630_v5 = vpop.permute.xlu1 %1629  ;;  %v1715_v52 = vadd.f32 %v1714_v6, %v1713_v48 }
 0x4eb   :  { %v1699_v46 = vmul.f32 %v1630_v5, %v3038_v47 }
 0x4ec   :  { %v1716_v4 = vrot.slane %v1715_v52, 4 }
 0x4ed   :  { %v1722_v27 = vsel %vm1157_vm11, %v1699_v46, 0.0 }
 0x4ee   :  { %v1635_v61 = vpop.permute.xlu1 %1634 }
 0x4ef   :  { %v1700_v1 = vmul.f32 %v1635_v61, %v3035_v18 }
 0x4f1   :  { %v1723_v50 = vsel %vm1157_vm11, %v1700_v1, 0.0 }
 0x4f2   :  { %v1640_v3 = vpop.permute.xlu1 %1639  ;;  %v1724_v24 = vadd.f32 %v1723_v50, %v1722_v27 }
 0x4f3   :  { %v1701_v55 = vmul.f32 %v1640_v3, %v3040_v49  ;;  %v1717_v3 = vadd.f32 %v1716_v4, %v1715_v52 }
 0x4f4   :  { %v1725_v2 = vrot.slane %v1724_v24, 4 }
 0x4f5   :  { %v1731_v13 = vsel %vm1157_vm11, %v1701_v55, 0.0  ;;  %v1718_v47 = vrot.slane %v1717_v3, 2 }
 0x4f6   :  { %v1645_v22 = vpop.permute.xlu1 %1644  ;;  %v1726_v30 = vadd.f32 %v1725_v2, %v1724_v24 }
 0x4f7   :  { %v1702_v57 = vmul.f32 %v1645_v22, %v3036_v11  ;;  %v1719_v8 = vadd.f32 %v1718_v47, %v1717_v3 }
 0x4f8   :  { %v1727_v1 = vrot.slane %v1726_v30, 2 }
 0x4f9   :  { %v1732_v42 = vsel %vm1157_vm11, %v1702_v57, 0.0 }
 0x4fa   :  { %v1650_v14 = vpop.permute.xlu1 %1649  ;;  %v1733_v7 = vadd.f32 %v1732_v42, %v1731_v13 }
 0x4fb   :  { %v1703_v45 = vmul.f32 %v1650_v14, %v3042_v29 }
 0x4fc   :  { %v1734_v0 = vrot.slane %v1733_v7, 4 }
 0x4fd   :  { %v1740_v31 = vsel %vm1157_vm11, %v1703_v45, 0.0  ;;  %v3050_v45 = vmax.f32 %v2686_v43, 0.0 }
 0x4fe   :  { %v1655_v62 = vpop.permute.xlu1 %1654  ;;  %v1735_v61 = vadd.f32 %v1734_v0, %v1733_v7 }
 0x4ff   :  { %v1704_v35 = vmul.f32 %v1655_v62, %v3039_v19  ;;  %v3047_v62 = vmax.f32 %v2660_v9, 0.0  ;;  %v3049_v19 = vmax.f32 %v2675_v40, 0.0  ;;  %v1728_v9 = vadd.f32 %v1727_v1, %v1726_v30 }
 0x500   :  { %v1736_v32 = vrot.slane %v1735_v61, 2 }
 0x501   :  { %v1741_v38 = vsel %vm1157_vm11, %v1704_v35, 0.0  ;;  %v1711_v35 = vmul.f32 %v1690_v51, %v3049_v19  ;;  %v1729_v6 = vrot.slane %v1728_v9, 1 }
 0x502   :  { %v1665_v59 = vpop.permute.xlu1 %1664  ;;  %v1742_v10 = vadd.f32 %v1741_v38, %v1740_v31  ;;  %v1737_v29 = vadd.f32 %v1736_v32, %v1735_v61 }
 0x503   :  { %v1706_v60 = vmul.f32 %v1665_v59, %v3043_v39  ;;  %v1776_v20 = vsel %vm1157_vm11, %v1711_v35, 0.0  ;;  %v1730_v43 = vadd.f32 %v1729_v6, %v1728_v9 }
 0x504   :  { %v1743_v23 = vrot.slane %v1742_v10, 4  ;;  %v1738_v13 = vrot.slane %v1737_v29, 1 }
 0x505   :  { %v1750_v53 = vsel %vm1157_vm11, %v1706_v60, 0.0 }
 0x506   :  { %v1670_v54 = vpop.permute.xlu1 %1669  ;;  %v1751_v12 = vadd.f32 %v1750_v53, %v1749_v56  ;;  %v1744_v15 = vadd.f32 %v1743_v23, %v1742_v10  ;;  %v1720_v53 = vrot.slane %v1719_v8, 1 }
 0x507   :  { %v1707_v44 = vmul.f32 %v1670_v54, %v3045_v17 }
 0x508   :  { %v1752_v16 = vrot.slane %v1751_v12, 4  ;;  %v1745_v46 = vrot.slane %v1744_v15, 2  ;;  %v1721_v17 = vadd.f32 %v1720_v53, %v1719_v8 }
 0x509   :  { %v1758_v26 = vsel %vm1157_vm11, %v1707_v44, 0.0 }
 0x50a   :  { %v1675_v58 = vpop.permute.xlu1 %1674  ;;  %v1753_v14 = vadd.f32 %v1752_v16, %v1751_v12  ;;  %v1746_v60 = vadd.f32 %v1745_v46, %v1744_v15  ;;  %v1739_v12 = vadd.f32 %v1738_v13, %v1737_v29 }
 0x50b   :  { %v1708_v41 = vmul.f32 %v1675_v58, %v3046_v33  ;;  %v1793_v33 = vsel %vm1298_vm13, %v1730_v43, %v1721_v17 }
 0x50c   :  { %v1754_v49 = vrot.slane %v1753_v14, 2  ;;  %v1747_v54 = vrot.slane %v1746_v60, 1  ;;  %v1794_v16 = vsel %vm1300_vm14, %v1739_v12, %v1793_v33 }
 0x50d   :  { %v1759_v36 = vsel %vm1157_vm11, %v1708_v41, 0.0 }
 0x50e   :  { %v1760_v34 = vadd.f32 %v1759_v36, %v1758_v26  ;;  %v1680_v5 = vpop.permute.xlu1 %1679  ;;  %v1755_v40 = vadd.f32 %v1754_v49, %v1753_v14  ;;  %v1748_v44 = vadd.f32 %v1747_v54, %v1746_v60 }
 0x50f   :  { %v1709_v18 = vmul.f32 %v1680_v5, %v3047_v62 }
 0x510   :  { %v1761_v22 = vrot.slane %v1760_v34, 4  ;;  %v1756_v31 = vrot.slane %v1755_v40, 1  ;;  %v1795_v36 = vsel %vm1302_vm15, %v1748_v44, %v1794_v16 }
 0x511   :  { %v1767_v55 = vsel %vm1157_vm11, %v1709_v18, 0.0 }
 0x512   :  { %v1762_v11 = vadd.f32 %v1761_v22, %v1760_v34  ;;  %v1685_v57 = vpop.permute.xlu1 %1684  ;;  %v1757_v0 = vadd.f32 %v1756_v31, %v1755_v40 }
 0x513   :  { %v1710_v25 = vmul.f32 %v1685_v57, %v3048_v21 }
 0x514   :  { %v1763_v28 = vrot.slane %v1762_v11, 2  ;;  %v1796_v30 = vsel %vm1304_vm0, %v1757_v0, %v1795_v36 }
 0x515   :  { %v1768_v59 = vsel %vm1157_vm11, %v1710_v25, 0.0 }
 0x516   :  { %v1769_v37 = vadd.f32 %v1768_v59, %v1767_v55  ;;  %v1695_v50 = vpop.permute.xlu1 %1694  ;;  %v1764_v27 = vadd.f32 %v1763_v28, %v1762_v11 }
 0x517   :  { %v1712_v39 = vmul.f32 %v1695_v50, %v3050_v45 }
 0x518   :  { %v1770_v63 = vrot.slane %v1769_v37, 4  ;;  %v1765_v56 = vrot.slane %v1764_v27, 1 }
 0x519   :  { %v1777_v42 = vsel %vm1157_vm11, %v1712_v39, 0.0 }
 0x51a   :  { %v1771_v38 = vadd.f32 %v1770_v63, %v1769_v37  ;;  %v1778_v24 = vadd.f32 %v1777_v42, %v1776_v20  ;;  %v1766_v41 = vadd.f32 %v1765_v56, %v1764_v27 }
 0x51c   :  { %v1772_v48 = vrot.slane %v1771_v38, 2  ;;  %v1779_v7 = vrot.slane %v1778_v24, 4  ;;  %v1797_v5 = vsel %vm1306_vm1, %v1766_v41, %v1796_v30 }
 0x51e   :  { %v1773_v52 = vadd.f32 %v1772_v48, %v1771_v38  ;;  %v1780_v10 = vadd.f32 %v1779_v7, %v1778_v24 }
 0x520   :  { %v1774_v2 = vrot.slane %v1773_v52, 1  ;;  %v1781_v58 = vrot.slane %v1780_v10, 2 }
 0x522   :  { %v1782_v4 = vadd.f32 %v1781_v58, %v1780_v10  ;;  %v1775_v23 = vadd.f32 %v1774_v2, %v1773_v52 }
 0x524   :  { %v1783_v26 = vrot.slane %v1782_v4, 1  ;;  %v1798_v61 = vsel %vm1308_vm2, %v1775_v23, %v1797_v5 }
 0x526   :  { %v1784_v34 = vadd.f32 %v1783_v26, %v1782_v4 }
 0x528   :  { %v1799_v3 = vsel %vm1310_vm3, %v1784_v34, %v1798_v61 }
 0x529   :  { %1801 = vst.msk [vmem:[#allocation2] sm:$0xff] %vm1157_vm11, %v1799_v3 }
 0x52a   :  { %2082 = shalt.err (!%p2079_p4)
}
 0x52b   :  { %1811 = dma.vmem_to_hbm [thread:$0]  %s1809_s13, 128, %s3008_s7, [#allocation3]  }
 0x52c   :  { %2091 = dma.done.wait [#allocation3], 128  }
 0x52d   :  { %2092 = vsyncadd [#allocation3], 4294967168 }
 0x52e   :  { %1815 = vsyncpa [#allocation3], 1 }

</bundles_post_ra>
